<compile_context>
chip_gen: v5e
topology: v5e:2x2
jax: 0.10.0
libtpu: 0.0.40
codegen_flags: <defaults>
</compile_context>

<pallas_src>
import functools
from typing import NamedTuple, Optional

import jax
import jax.numpy as jnp
from jax.experimental import pallas as pl
from jax.experimental.pallas import tpu as pltpu


def _round_up(x: int, m: int) -> int:
    return ((x + m - 1) // m) * m


def _cdiv(a: int, b: int) -> int:
    return -(-a // b)


def _tpu_defaults():
    """Per-generation tiling / VMEM defaults (safe fallback for unknown chips)."""
    kind = ""
    try:
        kind = jax.devices()[0].device_kind.lower()
    except Exception:  # pragma: no cover - defensive
        pass
    if "v7" in kind:
        # 64 MiB VMEM per TC, 2 TCs/chip, ridge ~310 FLOP/byte.
        return dict(tm=512, tile_i=512, vmem_limit=52 * 1024 * 1024,
                    weight_buffers=2, min_m_tiles=2)
    if "v6" in kind:
        # 128 MiB VMEM, ridge ~650 FLOP/byte -> bigger tm / tile_i.
        return dict(tm=768, tile_i=1024, vmem_limit=100 * 1024 * 1024,
                    weight_buffers=2, min_m_tiles=1)
    if "v5e" in kind or "v5 lite" in kind or "v5lite" in kind:
        # 128 MiB VMEM; weight DMA ~= compute at these tiles -> triple-buffer weights.
        return dict(tm=512, tile_i=1024, vmem_limit=100 * 1024 * 1024,
                    weight_buffers=3, min_m_tiles=1)
    # Unknown chip: conservative.
    return dict(tm=512, tile_i=512, vmem_limit=48 * 1024 * 1024,
                weight_buffers=2, min_m_tiles=1)


class LlamaMLPWeights(NamedTuple):
    """Packed weights + the fusion stride they were packed with."""
    wgu: jax.Array    # (H, 2*I_pad): per-tile fused [gate_tile_j | up_tile_j], transposed
    wd_t: jax.Array   # (I_pad, H): transposed down_proj
    tile_i: int       # intermediate tile size used for the fusion (multiple of 128)


# ----------------------------------------------------------------------------
# Kernels
# ----------------------------------------------------------------------------
def _llama_mlp_kernel_f32(x_ref, wgu_ref, wd_ref, o_ref):
    """f32 output: accumulate directly into the VMEM-resident output block.

    x_ref  : (TM, H)      activation row-tile (constant over the reduction axis)
    wgu_ref: (H, 2*TI)    fused [gate | up] transposed weight tile
    wd_ref : (TI, H)      down_proj transposed weight tile
    o_ref  : (TM, H) f32  output block (constant index along reduction axis)
    """
    j = pl.program_id(1)

    @pl.when(j == 0)
    def _():
        o_ref[...] = jnp.zeros_like(o_ref)

    x = x_ref[...]
    gu = jnp.dot(x, wgu_ref[...], preferred_element_type=jnp.float32)
    half = gu.shape[-1] // 2
    h = jax.nn.silu(gu[:, :half]) * gu[:, half:]
    o_ref[...] += jnp.dot(h.astype(wd_ref.dtype), wd_ref[...],
                          preferred_element_type=jnp.float32)


def _llama_mlp_kernel_acc(x_ref, wgu_ref, wd_ref, o_ref, acc_ref):
    """Non-f32 output: f32 scratch accumulator, cast once at the end."""
    j = pl.program_id(1)

    @pl.when(j == 0)
    def _():
        acc_ref[...] = jnp.zeros_like(acc_ref)

    x = x_ref[...]
    gu = jnp.dot(x, wgu_ref[...], preferred_element_type=jnp.float32)
    half = gu.shape[-1] // 2
    h = jax.nn.silu(gu[:, :half]) * gu[:, half:]
    acc_ref[...] += jnp.dot(h.astype(wd_ref.dtype), wd_ref[...],
                            preferred_element_type=jnp.float32)

    @pl.when(j == pl.num_programs(1) - 1)
    def _():
        o_ref[...] = acc_ref[...].astype(o_ref.dtype)


# ----------------------------------------------------------------------------
# One-time (load-time) weight prep.  Keep OUT of the jitted hot path.
# ----------------------------------------------------------------------------
def prepare_llama_mlp_weights(wg, wu, wd, *, tile_i: Optional[int] = None,
                              dtype=None) -> LlamaMLPWeights:
    """wg, wu: (I, H) torch nn.Linear layout; wd: (H, I).

    dtype=jnp.bfloat16 is the recommended setting for f32 checkpoints (bf16 MXU
    throughput + halved weight bandwidth; f32 accumulation is kept in-kernel).
    """
    I, H = wg.shape
    assert wu.shape == (I, H) and wd.shape == (H, I)

    if dtype is not None:
        wg = wg.astype(dtype)
        wu = wu.astype(dtype)
        wd = wd.astype(dtype)

    cfg = _tpu_defaults()
    w_item = jnp.dtype(wg.dtype).itemsize
    if tile_i is None:
        tile_i = cfg["tile_i"]
        # Clamp so the (multi-)buffered weight tiles stay well under the VMEM
        # budget: buffers * (2*ti*H + ti*H) * itemsize  <=  ~45% of the limit.
        budget = int(0.45 * cfg["vmem_limit"])
        max_ti = budget // (max(2, cfg["weight_buffers"]) * 3 * H * w_item)
        if max_ti >= 128:
            tile_i = min(tile_i, (max_ti // 128) * 128)
        tile_i = max(128, tile_i)
    assert tile_i % 128 == 0, "tile_i must be a multiple of 128"

    ti = min(tile_i, _round_up(I, 128))
    I_pad = _round_up(I, ti)

    if I_pad != I:
        pad = I_pad - I
        # Zero-padding the intermediate dim is exact: silu(0)*u == 0 and the
        # padded down_proj rows are zero.
        wg = jnp.pad(wg, ((0, pad), (0, 0)))
        wu = jnp.pad(wu, ((0, pad), (0, 0)))
        wd = jnp.pad(wd, ((0, 0), (0, pad)))

    nt = I_pad // ti
    wg_t = wg.T.reshape(H, nt, ti)                      # (H, nt, ti)
    wu_t = wu.T.reshape(H, nt, ti)
    # Per-tile fusion: block j (width 2*ti) holds [gate_tile_j | up_tile_j].
    wgu = jnp.concatenate([wg_t, wu_t], axis=2).reshape(H, 2 * I_pad)
    wd_t = wd.T                                          # (I_pad, H)
    return LlamaMLPWeights(wgu=wgu, wd_t=wd_t, tile_i=ti)


# ----------------------------------------------------------------------------
# Forward
# ----------------------------------------------------------------------------
@functools.partial(
    jax.jit,
    static_argnames=("tile_i", "tm", "min_m_tiles", "vmem_limit", "weight_buffers"))
def _llama_mlp_impl(x, wgu, wd_t, *, tile_i, tm, min_m_tiles, vmem_limit,
                    weight_buffers):
    B, S, H = x.shape
    I_pad, H2 = wd_t.shape
    assert H2 == H, "down_proj / activation hidden-size mismatch"
    assert wgu.shape == (H, 2 * I_pad), "fused [gate|up] weight shape mismatch"
    assert I_pad % tile_i == 0, "packed tile_i does not divide the padded intermediate dim"

    out_dtype = x.dtype
    M = B * S
    x2d = x.reshape(M, H).astype(wgu.dtype)      # compute in the weight dtype

    item = jnp.dtype(wgu.dtype).itemsize
    # Sublane-group granularity of the M axis for the compute dtype.
    mult = {4: 8, 2: 16, 1: 32}.get(item, 8)
    f32_out = out_dtype == jnp.float32

    # --- clamp tm to the VMEM budget (double-buffered weights + x/out blocks) ---
    w_bufs = max(2, weight_buffers)
    w_bytes = w_bufs * 3 * tile_i * H * item              # (2*ti*H + ti*H) per buffer
    per_row = H * (2 * item + 2 * jnp.dtype(out_dtype).itemsize + (0 if f32_out else 4))
    avail = vmem_limit - 4 * 1024 * 1024 - w_bytes        # headroom for compiler scratch
    if avail > per_row * mult:
        tm_budget = max(mult, (avail // per_row) // mult * mult)
    else:
        tm_budget = mult
    tm_target = max(mult, min(tm, tm_budget))

    # --- balanced M tiling; >=2 tiles on dual-TC chips when M allows ------------
    n_tiles = _cdiv(M, tm_target)
    if n_tiles < min_m_tiles and M > (min_m_tiles - 1) * mult:
        n_tiles = min_m_tiles
    tm_eff = _round_up(_cdiv(M, n_tiles), mult)
    M_pad = tm_eff * n_tiles
    if M_pad != M:
        x2d = jnp.pad(x2d, ((0, M_pad - M), (0, 0)))

    grid = (n_tiles, I_pad // tile_i)                     # reduction axis last

    if f32_out:
        kernel = _llama_mlp_kernel_f32
        scratch = []
    else:
        kernel = _llama_mlp_kernel_acc
        scratch = [pltpu.VMEM((tm_eff, H), jnp.float32)]

    x_spec = pl.BlockSpec((tm_eff, H), lambda i, j: (i, 0))
    out_spec = pl.BlockSpec((tm_eff, H), lambda i, j: (i, 0))   # resident over j
    if weight_buffers > 2:
        # v5e: triple-buffer the streamed weight tiles to hide exposed DMA jitter.
        wgu_spec = pl.BlockSpec((H, 2 * tile_i), lambda i, j: (0, j),
                                pipeline_mode=pl.Buffered(weight_buffers))
        wd_spec = pl.BlockSpec((tile_i, H), lambda i, j: (j, 0),
                               pipeline_mode=pl.Buffered(weight_buffers))
    else:
        wgu_spec = pl.BlockSpec((H, 2 * tile_i), lambda i, j: (0, j))
        wd_spec = pl.BlockSpec((tile_i, H), lambda i, j: (j, 0))

    w_total = wgu.size * wgu.dtype.itemsize + wd_t.size * wd_t.dtype.itemsize
    io_bytes = M_pad * H * (item + jnp.dtype(out_dtype).itemsize)
    cost = pl.CostEstimate(
        flops=6 * M_pad * H * I_pad,
        transcendentals=M_pad * I_pad,
        bytes_accessed=w_total * n_tiles + io_bytes,
    )

    out = pl.pallas_call(
        kernel,
        out_shape=jax.ShapeDtypeStruct((M_pad, H), out_dtype),
        grid_spec=pltpu.PrefetchScalarGridSpec(
            num_scalar_prefetch=0,
            grid=grid,
            in_specs=[x_spec, wgu_spec, wd_spec],
            out_specs=out_spec,
            scratch_shapes=scratch,
        ),
        compiler_params=pltpu.CompilerParams(
            dimension_semantics=("parallel", "arbitrary"),
            vmem_limit_bytes=vmem_limit,
        ),
        cost_estimate=cost,
    )(x2d, wgu, wd_t)

    if M_pad != M:
        out = out[:M]
    return out.reshape(B, S, H)


def llama_mlp(x, weights: LlamaMLPWeights, *, tm: Optional[int] = None):
    """x: (B, S, H); weights: output of prepare_llama_mlp_weights."""
    cfg = _tpu_defaults()
    if tm is None:
        tm = cfg["tm"]
    return _llama_mlp_impl(
        x, weights.wgu, weights.wd_t,
        tile_i=weights.tile_i, tm=tm,
        min_m_tiles=cfg["min_m_tiles"],
        vmem_limit=cfg["vmem_limit"],
        weight_buffers=cfg["weight_buffers"])


# ----------------------------------------------------------------------------
# Tests
# ----------------------------------------------------------------------------
if __name__ == "__main__":
    key = jax.random.PRNGKey(0)

    def mlp_ref(x, wg, wu, wd):
        g = x @ wg.T
        u = x @ wu.T
        return (jax.nn.silu(g) * u) @ wd.T

    # --- Test 1: f32, TinyLlama-like (scaled-down) shapes -------------------
    batch, seq, hidden, inter = 2, 8, 256, 512
    k1, k2, k3, k4, key = jax.random.split(key, 5)
    x = jax.random.normal(k1, (batch, seq, hidden), jnp.float32)
    # Weights in PyTorch nn.Linear layout: (out_features, in_features), no bias.
    wg = jax.random.normal(k2, (inter, hidden), jnp.float32) * 0.02
    wu = jax.random.normal(k3, (inter, hidden), jnp.float32) * 0.02
    wd = jax.random.normal(k4, (hidden, inter), jnp.float32) * 0.02

    weights = prepare_llama_mlp_weights(wg, wu, wd)
    y = llama_mlp(x, weights)
    jax.block_until_ready(y)
    y_ref = mlp_ref(x, wg, wu, wd)
    assert jnp.allclose(y, y_ref, atol=1e-4, rtol=1e-4), "f32 mismatch vs reference"

    # --- Test 2: ragged M and non-pow2 intermediate (padding path) ----------
    b2, s2, h2, i2 = 1, 5, 128, 384
    k1, k2, k3, k4, key = jax.random.split(key, 5)
    x2 = jax.random.normal(k1, (b2, s2, h2), jnp.float32)
    wg2 = jax.random.normal(k2, (i2, h2), jnp.float32) * 0.02
    wu2 = jax.random.normal(k3, (i2, h2), jnp.float32) * 0.02
    wd2 = jax.random.normal(k4, (h2, i2), jnp.float32) * 0.02
    weights2 = prepare_llama_mlp_weights(wg2, wu2, wd2)
    y2 = llama_mlp(x2, weights2)
    jax.block_until_ready(y2)
    y2_ref = mlp_ref(x2, wg2, wu2, wd2)
    assert jnp.allclose(y2, y2_ref, atol=1e-4, rtol=1e-4), "padded-shape mismatch"

    # --- Test 3: bf16 compute path (recommended for f32 checkpoints) --------
    xb = x.astype(jnp.bfloat16)
    weights_b = prepare_llama_mlp_weights(wg, wu, wd, dtype=jnp.bfloat16)
    yb = llama_mlp(xb, weights_b)
    jax.block_until_ready(yb)
    yb_ref = mlp_ref(xb.astype(jnp.float32),
                     wg.astype(jnp.bfloat16).astype(jnp.float32),
                     wu.astype(jnp.bfloat16).astype(jnp.float32),
                     wd.astype(jnp.bfloat16).astype(jnp.float32))
    assert jnp.allclose(yb.astype(jnp.float32), yb_ref,
                        atol=5e-3, rtol=5e-2), "bf16 mismatch vs reference"

    print("KERNEL_OK")
</pallas_src>

<mosaic_0001>
module attributes {stable_mosaic.version = 11 : i64} {
  func.func @_llama_mlp_kernel_f32(%arg0: i32, %arg1: i32, %arg2: memref<16x256xf32, #tpu.memory_space<vmem>>, %arg3: memref<256x1024xf32, #tpu.memory_space<vmem>>, %arg4: memref<512x256xf32, #tpu.memory_space<vmem>>, %arg5: memref<16x256xf32, #tpu.memory_space<vmem>>) attributes {dimension_semantics = [#tpu.dimension_semantics<parallel>, #tpu.dimension_semantics<arbitrary>], iteration_bounds = array<i64: 1, 1>, scalar_prefetch = 0 : i64, scratch_operands = 0 : i64, tpu.core_type = #tpu.core_type<tc>, window_params = [{transform_indices = @transform_0, window_bounds = array<i64: 16, 256>}, {transform_indices = @transform_1, window_bounds = array<i64: 256, 1024>}, {transform_indices = @transform_2, window_bounds = array<i64: 512, 256>}, {transform_indices = @transform_3, window_bounds = array<i64: 16, 256>}]} {
    %c0_i32 = arith.constant 0 : i32
    %0 = arith.cmpi eq, %arg1, %c0_i32 : i32
    %1 = arith.extui %0 : i1 to i32
    %c0_i32_0 = arith.constant 0 : i32
    %2 = arith.cmpi ne, %1, %c0_i32_0 : i32
    scf.if %2 {
      %cst_12 = arith.constant 0.000000e+00 : f32
      %20 = vector.broadcast %cst_12 : f32 to vector<16x256xf32>
      %c0_13 = arith.constant 0 : index
      %c0_14 = arith.constant 0 : index
      %21 = vector.load %arg5[%c0_13, %c0_14] : memref<16x256xf32, #tpu.memory_space<vmem>>, vector<16x256xf32>
      tpu.vector_store %arg5[%c0_13, %c0_14], %20 {strides = array<i32>} : memref<16x256xf32, #tpu.memory_space<vmem>>, vector<16x256xf32>,
    } else {
    }
    %c0 = arith.constant 0 : index
    %c0_1 = arith.constant 0 : index
    %3 = vector.load %arg2[%c0, %c0_1] : memref<16x256xf32, #tpu.memory_space<vmem>>, vector<16x256xf32>
    %c0_2 = arith.constant 0 : index
    %c0_3 = arith.constant 0 : index
    %4 = vector.load %arg3[%c0_2, %c0_3] : memref<256x1024xf32, #tpu.memory_space<vmem>>, vector<256x1024xf32>
    %cst = arith.constant dense<0.000000e+00> : vector<16x1024xf32>
    %5 = tpu.matmul %3, %4, %cst {dimension_numbers = #tpu.dot_dimension_numbers<[1], [0], [0], [1], [0, 0, 1, 1], [], []>} : vector<16x256xf32>, vector<256x1024xf32>, vector<16x1024xf32> -> vector<16x1024xf32>
    %6 = vector.extract_strided_slice %5 {offsets = [0, 0], sizes = [16, 512], strides = [1, 1]} : vector<16x1024xf32> to vector<16x512xf32>
    %7 = arith.negf %6 : vector<16x512xf32>
    %8 = math.exp %7 : vector<16x512xf32>
    %cst_4 = arith.constant 1.000000e+00 : f32
    %9 = vector.broadcast %cst_4 : f32 to vector<16x512xf32>
    %10 = arith.addf %9, %8 : vector<16x512xf32>
    %11 = arith.divf %9, %10 : vector<16x512xf32>
    %12 = arith.mulf %6, %11 : vector<16x512xf32>
    %13 = vector.extract_strided_slice %5 {offsets = [0, 512], sizes = [16, 512], strides = [1, 1]} : vector<16x1024xf32> to vector<16x512xf32>
    %14 = arith.mulf %12, %13 : vector<16x512xf32>
    %c0_5 = arith.constant 0 : index
    %c0_6 = arith.constant 0 : index
    %15 = vector.load %arg5[%c0_5, %c0_6] : memref<16x256xf32, #tpu.memory_space<vmem>>, vector<16x256xf32>
    %c0_7 = arith.constant 0 : index
    %c0_8 = arith.constant 0 : index
    %16 = vector.load %arg4[%c0_7, %c0_8] : memref<512x256xf32, #tpu.memory_space<vmem>>, vector<512x256xf32>
    %cst_9 = arith.constant dense<0.000000e+00> : vector<16x256xf32>
    %17 = tpu.matmul %14, %16, %cst_9 {dimension_numbers = #tpu.dot_dimension_numbers<[1], [0], [0], [1], [0, 0, 1, 1], [], []>} : vector<16x512xf32>, vector<512x256xf32>, vector<16x256xf32> -> vector<16x256xf32>
    %18 = arith.addf %15, %17 : vector<16x256xf32>
    %c0_10 = arith.constant 0 : index
    %c0_11 = arith.constant 0 : index
    %19 = vector.load %arg5[%c0_10, %c0_11] : memref<16x256xf32, #tpu.memory_space<vmem>>, vector<16x256xf32>
    tpu.vector_store %arg5[%c0_10, %c0_11], %18 {strides = array<i32>} : memref<16x256xf32, #tpu.memory_space<vmem>>, vector<16x256xf32>,
    return
  }
  func.func @transform_0(%arg0: i32, %arg1: i32) -> (i32, i32) {
    %c0_i32 = arith.constant 0 : i32
    %c0_i32_0 = arith.constant 0 : i32
    return %arg0, %c0_i32 : i32, i32
  }
  func.func @transform_1(%arg0: i32, %arg1: i32) -> (i32, i32) {
    %c0_i32 = arith.constant 0 : i32
    %c0_i32_0 = arith.constant 0 : i32
    return %c0_i32, %arg1 : i32, i32
  }
  func.func @transform_2(%arg0: i32, %arg1: i32) -> (i32, i32) {
    %c0_i32 = arith.constant 0 : i32
    %c0_i32_0 = arith.constant 0 : i32
    return %arg1, %c0_i32 : i32, i32
  }
  func.func @transform_3(%arg0: i32, %arg1: i32) -> (i32, i32) {
    %c0_i32 = arith.constant 0 : i32
    %c0_i32_0 = arith.constant 0 : i32
    return %arg0, %c0_i32 : i32, i32
  }
}

</mosaic_0001>

<bundles_post_ra>
// kernel: _llama_mlp_impl.1
= control target key start
LH: loop header
LB: loop body
LE: loop exit
PB: predicated region body
PF: predicated region fallthrough
CT: control target
= control target key end

     0   :  { %8 = vsyncpa [#allocation3], 0  ;;  %s1692_s0 = inlined_call_operand.hbm [shape: f32[16,256], index: 0, kind: input, shape index: {}]   ;;  %s1693_s1 = inlined_call_operand.hbm [shape: f32[256,1024], index: 1, kind: input, shape index: {}]   ;;  %s1694_s2 = inlined_call_operand.hbm [shape: f32[512,256], index: 2, kind: input, shape index: {}]   ;;  %s1695_s3 = inlined_call_operand.hbm [shape: f32[16,256], index: 3, kind: output, shape index: {}]  }
   0x1   :  { %9 = vsyncpa [#allocation6], 0  ;;  %s28_s14 = sshll.u32 %s1693_s1, 4  ;;  %s29_s14 = int_to_ptr.hbm [resolvable:$true] %s28_s14 }
   0x2   :  { %10 = vsyncpa [#allocation4], 0  ;;  %s1361_s15 = smov [#allocation5]   ;;  %s15_s19 = sshll.u32 %s1692_s0, 4  ;;  %s16_s19 = int_to_ptr.hbm [resolvable:$true] %s15_s19 }
   0x3   :  { %s30_s16 = sshll.u32 %s1361_s15, 4  ;;  %s1362_s20 = smov 1024   ;;  %s31_s16 = int_to_ptr.vmem [resolvable:$true] %s30_s16 }
   0x4   :  { %s1363_s21 = smov 64   ;;  %s1364_s22 = smov [#allocation2]  }
   0x5   :  { %36 = dma.hbm_to_vmem [thread:$0]  %s29_s14, 32768, %s31_s16, [#allocation6], %s1362_s20, %s1362_s20, %s1363_s21  }
   0x6   :  { %s17_s23 = sshll.u32 %s1364_s22, 4  ;;  %s1365_s24 = smov 256   ;;  %s18_s23 = int_to_ptr.vmem [resolvable:$true] %s17_s23 }
   0x7   :  { %s1366_s25 = smov 16   ;;  %s41_s27 = sshll.u32 %s1694_s2, 4  ;;  %s42_s27 = int_to_ptr.hbm [resolvable:$true] %s41_s27 }
   0x8   :  { %23 = dma.hbm_to_vmem [thread:$0]  %s16_s19, 512, %s18_s23, [#allocation3], %s1365_s24, %s1365_s24, %s1366_s25  }
   0x9   :  { %s1367_s28 = smov [#allocation7]  }
   0xa   :  { %s43_s0 = sshll.u32 %s1367_s28, 4  ;;  %s44_s0 = int_to_ptr.vmem [resolvable:$true] %s43_s0 }
   0xb   :  { %49 = dma.hbm_to_vmem [thread:$0]  %s42_s27, 16384, %s44_s0, [#allocation6], %s1365_s24, %s1365_s24, %s1366_s25  }
   0xc   :  { %1355 = dma.done.wait [#allocation3], 512  }
   0xd   :  { %1356 = vsyncadd [#allocation3], 4294966784 }
   0xe   :  { %1357 = dma.done.wait [#allocation6], 49152  }
   0xf   :  { %1358 = vsyncadd [#allocation6], 4294918144  ;;  %v194_v0 = vld [vmem:[#allocation5 + $0x3c0] sm:$0xff]  ;;  %v195_v2 = vld [vmem:[#allocation5 + $0x3c8] sm:$0xff]  ;;  %s1368_s2 = smov [#allocation8]   ;;  %s1196_s5 = sshll.u32 %s1695_s3, 4  ;;  %s1197_s5 = int_to_ptr.hbm [resolvable:$true] %s1196_s5 }
  0x10   :  { %v322_v1 = vld [vmem:[#allocation5 + $0x7c0] sm:$0xff]  ;;  %330 = vmatpush.msra.mxu0 %v194_v0  ;;  %v323_v3 = vld [vmem:[#allocation5 + $0x7c8] sm:$0xff]  ;;  %376 = vmatpush.msra.mxu2 %v195_v2  ;;  %v196_v0 = vld [vmem:[#allocation5 + $0x3d0] sm:$0xff]  ;;  %s1194_s29 = sshll.u32 %s1368_s2, 4  ;;  %s1195_s29 = int_to_ptr.vmem [resolvable:$true] %s1194_s29 }
  0x11   :  { %353 = vmatpush.msra.mxu1 %v322_v1  ;;  %v186_v4 = vld [vmem:[#allocation5 + $0x380] sm:$0xff]  ;;  %399 = vmatpush.msra.mxu3 %v323_v3  ;;  %v187_v6 = vld [vmem:[#allocation5 + $0x388] sm:$0xff]  ;;  %v324_v1 = vld [vmem:[#allocation5 + $0x7d0] sm:$0xff] }
  0x12   :  { %v314_v5 = vld [vmem:[#allocation5 + $0x780] sm:$0xff]  ;;  %v315_v7 = vld [vmem:[#allocation5 + $0x788] sm:$0xff]  ;;  %331 = vmatpush.msra.mxu0 %v186_v4  ;;  %377 = vmatpush.msra.mxu2 %v187_v6  ;;  %v197_v2 = vld [vmem:[#allocation5 + $0x3d8] sm:$0xff] }
  0x13   :  { %v178_v8 = vld [vmem:[#allocation5 + $0x340] sm:$0xff]  ;;  %354 = vmatpush.msra.mxu1 %v314_v5  ;;  %v179_v10 = vld [vmem:[#allocation5 + $0x348] sm:$0xff]  ;;  %400 = vmatpush.msra.mxu3 %v315_v7  ;;  %v325_v3 = vld [vmem:[#allocation5 + $0x7d8] sm:$0xff] }
  0x14   :  { %v306_v9 = vld [vmem:[#allocation5 + $0x740] sm:$0xff]  ;;  %v307_v11 = vld [vmem:[#allocation5 + $0x748] sm:$0xff]  ;;  %332 = vmatpush.msra.mxu0 %v178_v8  ;;  %378 = vmatpush.msra.mxu2 %v179_v10  ;;  %v188_v4 = vld [vmem:[#allocation5 + $0x390] sm:$0xff] }
  0x15   :  { %v170_v12 = vld [vmem:[#allocation5 + $0x300] sm:$0xff]  ;;  %355 = vmatpush.msra.mxu1 %v306_v9  ;;  %v171_v14 = vld [vmem:[#allocation5 + $0x308] sm:$0xff]  ;;  %401 = vmatpush.msra.mxu3 %v307_v11  ;;  %v316_v5 = vld [vmem:[#allocation5 + $0x790] sm:$0xff] }
  0x16   :  { %v298_v13 = vld [vmem:[#allocation5 + $0x700] sm:$0xff]  ;;  %v299_v15 = vld [vmem:[#allocation5 + $0x708] sm:$0xff]  ;;  %333 = vmatpush.msra.mxu0 %v170_v12  ;;  %379 = vmatpush.msra.mxu2 %v171_v14  ;;  %v189_v6 = vld [vmem:[#allocation5 + $0x398] sm:$0xff] }
  0x17   :  { %v162_v16 = vld [vmem:[#allocation5 + $0x2c0] sm:$0xff]  ;;  %356 = vmatpush.msra.mxu1 %v298_v13  ;;  %v163_v18 = vld [vmem:[#allocation5 + $0x2c8] sm:$0xff]  ;;  %402 = vmatpush.msra.mxu3 %v299_v15  ;;  %v317_v7 = vld [vmem:[#allocation5 + $0x798] sm:$0xff] }
  0x18   :  { %v290_v17 = vld [vmem:[#allocation5 + $0x6c0] sm:$0xff]  ;;  %v291_v19 = vld [vmem:[#allocation5 + $0x6c8] sm:$0xff]  ;;  %334 = vmatpush.msra.mxu0 %v162_v16  ;;  %380 = vmatpush.msra.mxu2 %v163_v18  ;;  %v180_v10 = vld [vmem:[#allocation5 + $0x350] sm:$0xff] }
  0x19   :  { %v154_v20 = vld [vmem:[#allocation5 + $0x280] sm:$0xff]  ;;  %357 = vmatpush.msra.mxu1 %v290_v17  ;;  %v155_v22 = vld [vmem:[#allocation5 + $0x288] sm:$0xff]  ;;  %403 = vmatpush.msra.mxu3 %v291_v19  ;;  %v308_v11 = vld [vmem:[#allocation5 + $0x750] sm:$0xff] }
  0x1a   :  { %v282_v21 = vld [vmem:[#allocation5 + $0x680] sm:$0xff]  ;;  %v283_v23 = vld [vmem:[#allocation5 + $0x688] sm:$0xff]  ;;  %335 = vmatpush.msra.mxu0 %v154_v20  ;;  %381 = vmatpush.msra.mxu2 %v155_v22  ;;  %v181_v12 = vld [vmem:[#allocation5 + $0x358] sm:$0xff] }
  0x1b   :  { %v146_v24 = vld [vmem:[#allocation5 + $0x240] sm:$0xff]  ;;  %358 = vmatpush.msra.mxu1 %v282_v21  ;;  %v147_v26 = vld [vmem:[#allocation5 + $0x248] sm:$0xff]  ;;  %404 = vmatpush.msra.mxu3 %v283_v23  ;;  %v309_v13 = vld [vmem:[#allocation5 + $0x758] sm:$0xff] }
  0x1c   :  { %v274_v25 = vld [vmem:[#allocation5 + $0x640] sm:$0xff]  ;;  %v275_v27 = vld [vmem:[#allocation5 + $0x648] sm:$0xff]  ;;  %336 = vmatpush.msra.mxu0 %v146_v24  ;;  %382 = vmatpush.msra.mxu2 %v147_v26  ;;  %v172_v14 = vld [vmem:[#allocation5 + $0x310] sm:$0xff] }
  0x1d   :  { %v138_v28 = vld [vmem:[#allocation5 + $0x200] sm:$0xff]  ;;  %359 = vmatpush.msra.mxu1 %v274_v25  ;;  %v139_v30 = vld [vmem:[#allocation5 + $0x208] sm:$0xff]  ;;  %405 = vmatpush.msra.mxu3 %v275_v27  ;;  %v300_v15 = vld [vmem:[#allocation5 + $0x710] sm:$0xff] }
  0x1e   :  { %v266_v29 = vld [vmem:[#allocation5 + $0x600] sm:$0xff]  ;;  %v267_v31 = vld [vmem:[#allocation5 + $0x608] sm:$0xff]  ;;  %337 = vmatpush.msra.mxu0 %v138_v28  ;;  %383 = vmatpush.msra.mxu2 %v139_v30  ;;  %v173_v16 = vld [vmem:[#allocation5 + $0x318] sm:$0xff] }
  0x1f   :  { %v130_v32 = vld [vmem:[#allocation5 + $0x1c0] sm:$0xff]  ;;  %360 = vmatpush.msra.mxu1 %v266_v29  ;;  %v131_v34 = vld [vmem:[#allocation5 + $0x1c8] sm:$0xff]  ;;  %406 = vmatpush.msra.mxu3 %v267_v31  ;;  %v301_v17 = vld [vmem:[#allocation5 + $0x718] sm:$0xff] }
  0x20   :  { %v258_v33 = vld [vmem:[#allocation5 + $0x5c0] sm:$0xff]  ;;  %v259_v35 = vld [vmem:[#allocation5 + $0x5c8] sm:$0xff]  ;;  %338 = vmatpush.msra.mxu0 %v130_v32  ;;  %384 = vmatpush.msra.mxu2 %v131_v34  ;;  %v164_v18 = vld [vmem:[#allocation5 + $0x2d0] sm:$0xff] }
  0x21   :  { %v122_v36 = vld [vmem:[#allocation5 + $0x180] sm:$0xff]  ;;  %361 = vmatpush.msra.mxu1 %v258_v33  ;;  %v123_v38 = vld [vmem:[#allocation5 + $0x188] sm:$0xff]  ;;  %407 = vmatpush.msra.mxu3 %v259_v35  ;;  %v292_v19 = vld [vmem:[#allocation5 + $0x6d0] sm:$0xff] }
  0x22   :  { %v250_v37 = vld [vmem:[#allocation5 + $0x580] sm:$0xff]  ;;  %v251_v39 = vld [vmem:[#allocation5 + $0x588] sm:$0xff]  ;;  %339 = vmatpush.msra.mxu0 %v122_v36  ;;  %385 = vmatpush.msra.mxu2 %v123_v38  ;;  %v165_v20 = vld [vmem:[#allocation5 + $0x2d8] sm:$0xff] }
  0x23   :  { %v114_v40 = vld [vmem:[#allocation5 + $0x140] sm:$0xff]  ;;  %362 = vmatpush.msra.mxu1 %v250_v37  ;;  %v115_v42 = vld [vmem:[#allocation5 + $0x148] sm:$0xff]  ;;  %408 = vmatpush.msra.mxu3 %v251_v39  ;;  %v293_v21 = vld [vmem:[#allocation5 + $0x6d8] sm:$0xff] }
  0x24   :  { %v242_v41 = vld [vmem:[#allocation5 + $0x540] sm:$0xff]  ;;  %v243_v43 = vld [vmem:[#allocation5 + $0x548] sm:$0xff]  ;;  %340 = vmatpush.msra.mxu0 %v114_v40  ;;  %386 = vmatpush.msra.mxu2 %v115_v42  ;;  %v156_v22 = vld [vmem:[#allocation5 + $0x290] sm:$0xff] }
  0x25   :  { %v106_v44 = vld [vmem:[#allocation5 + $0x100] sm:$0xff]  ;;  %363 = vmatpush.msra.mxu1 %v242_v41  ;;  %v107_v46 = vld [vmem:[#allocation5 + $0x108] sm:$0xff]  ;;  %409 = vmatpush.msra.mxu3 %v243_v43  ;;  %v284_v23 = vld [vmem:[#allocation5 + $0x690] sm:$0xff] }
  0x26   :  { %v234_v45 = vld [vmem:[#allocation5 + $0x500] sm:$0xff]  ;;  %v235_v47 = vld [vmem:[#allocation5 + $0x508] sm:$0xff]  ;;  %341 = vmatpush.msra.mxu0 %v106_v44  ;;  %387 = vmatpush.msra.mxu2 %v107_v46  ;;  %v157_v24 = vld [vmem:[#allocation5 + $0x298] sm:$0xff] }
  0x27   :  { %v98_v48 = vld [vmem:[#allocation5 + $0xc0] sm:$0xff]  ;;  %364 = vmatpush.msra.mxu1 %v234_v45  ;;  %v99_v50 = vld [vmem:[#allocation5 + $0xc8] sm:$0xff]  ;;  %410 = vmatpush.msra.mxu3 %v235_v47  ;;  %v285_v25 = vld [vmem:[#allocation5 + $0x698] sm:$0xff] }
  0x28   :  { %v226_v49 = vld [vmem:[#allocation5 + $0x4c0] sm:$0xff]  ;;  %v227_v51 = vld [vmem:[#allocation5 + $0x4c8] sm:$0xff]  ;;  %342 = vmatpush.msra.mxu0 %v98_v48  ;;  %388 = vmatpush.msra.mxu2 %v99_v50  ;;  %v148_v26 = vld [vmem:[#allocation5 + $0x250] sm:$0xff] }
  0x29   :  { %v90_v52 = vld [vmem:[#allocation5 + $0x80] sm:$0xff]  ;;  %365 = vmatpush.msra.mxu1 %v226_v49  ;;  %v91_v54 = vld [vmem:[#allocation5 + $0x88] sm:$0xff]  ;;  %411 = vmatpush.msra.mxu3 %v227_v51  ;;  %v276_v27 = vld [vmem:[#allocation5 + $0x650] sm:$0xff] }
  0x2a   :  { %v218_v53 = vld [vmem:[#allocation5 + $0x480] sm:$0xff]  ;;  %v219_v55 = vld [vmem:[#allocation5 + $0x488] sm:$0xff]  ;;  %343 = vmatpush.msra.mxu0 %v90_v52  ;;  %389 = vmatpush.msra.mxu2 %v91_v54  ;;  %v149_v28 = vld [vmem:[#allocation5 + $0x258] sm:$0xff] }
  0x2b   :  { %v82_v56 = vld [vmem:[#allocation5 + $0x40] sm:$0xff]  ;;  %366 = vmatpush.msra.mxu1 %v218_v53  ;;  %v83_v58 = vld [vmem:[#allocation5 + $0x48] sm:$0xff]  ;;  %412 = vmatpush.msra.mxu3 %v219_v55  ;;  %v277_v29 = vld [vmem:[#allocation5 + $0x658] sm:$0xff] }
  0x2c   :  { %v210_v57 = vld [vmem:[#allocation5 + $0x440] sm:$0xff]  ;;  %v211_v59 = vld [vmem:[#allocation5 + $0x448] sm:$0xff]  ;;  %344 = vmatpush.msra.mxu0 %v82_v56  ;;  %390 = vmatpush.msra.mxu2 %v83_v58  ;;  %v140_v30 = vld [vmem:[#allocation5 + $0x210] sm:$0xff] }
  0x2d   :  { %v74_v60 = vld [vmem:[#allocation5] sm:$0xff]  ;;  %367 = vmatpush.msra.mxu1 %v210_v57  ;;  %v75_v62 = vld [vmem:[#allocation5 + $0x8] sm:$0xff]  ;;  %413 = vmatpush.msra.mxu3 %v211_v59  ;;  %v268_v31 = vld [vmem:[#allocation5 + $0x610] sm:$0xff] }
  0x2e   :  { %v202_v61 = vld [vmem:[#allocation5 + $0x400] sm:$0xff]  ;;  %v203_v63 = vld [vmem:[#allocation5 + $0x408] sm:$0xff]  ;;  %345 = vmatpush.msra.mxu0 %v74_v60  ;;  %391 = vmatpush.msra.mxu2 %v75_v62  ;;  %v141_v32 = vld [vmem:[#allocation5 + $0x218] sm:$0xff] }
  0x2f   :  { %368 = vmatpush.msra.mxu1 %v202_v61  ;;  %414 = vmatpush.msra.mxu3 %v203_v63  ;;  %v1404_v8 = vld [vmem:[#allocation2] sm:$0xff]  ;;  %v1406_v9 = vld [vmem:[#allocation2 + $0x8] sm:$0xff]  ;;  %v269_v33 = vld [vmem:[#allocation5 + $0x618] sm:$0xff] }
  0x30   :  { %422 = vmatpush.msrb.mxu0 %v196_v0  ;;  %468 = vmatpush.msrb.mxu2 %v197_v2  ;;  %v132_v34 = vld [vmem:[#allocation5 + $0x1d0] sm:$0xff]  ;;  %v133_v36 = vld [vmem:[#allocation5 + $0x1d8] sm:$0xff] }
  0x31   :  { %445 = vmatpush.msrb.mxu1 %v324_v1  ;;  %491 = vmatpush.msrb.mxu3 %v325_v3  ;;  %v260_v35 = vld [vmem:[#allocation5 + $0x5d0] sm:$0xff]  ;;  %v261_v37 = vld [vmem:[#allocation5 + $0x5d8] sm:$0xff] }
  0x32   :  { %423 = vmatpush.msrb.mxu0 %v188_v4  ;;  %469 = vmatpush.msrb.mxu2 %v189_v6  ;;  %v124_v38 = vld [vmem:[#allocation5 + $0x190] sm:$0xff]  ;;  %v125_v40 = vld [vmem:[#allocation5 + $0x198] sm:$0xff]  ;;  %v198_v4 = vld [vmem:[#allocation5 + $0x3e0] sm:$0xff] }
  0x33   :  { %446 = vmatpush.msrb.mxu1 %v316_v5  ;;  %492 = vmatpush.msrb.mxu3 %v317_v7  ;;  %v252_v39 = vld [vmem:[#allocation5 + $0x590] sm:$0xff]  ;;  %v253_v41 = vld [vmem:[#allocation5 + $0x598] sm:$0xff]  ;;  %v326_v5 = vld [vmem:[#allocation5 + $0x7e0] sm:$0xff] }
  0x34   :  { %392 = vmatmul.f32.vlgmr.msra.gmra.mxu2 %v1404_v8  ;;  %415 = vmatmul.f32.vlgmr.msra.gmra.mxu3 %v1406_v9  ;;  %v116_v42 = vld [vmem:[#allocation5 + $0x150] sm:$0xff]  ;;  %v117_v44 = vld [vmem:[#allocation5 + $0x158] sm:$0xff]  ;;  %v199_v6 = vld [vmem:[#allocation5 + $0x3e8] sm:$0xff] }
  0x35   :  { %424 = vmatpush.msrb.mxu0 %v180_v10  ;;  %447 = vmatpush.msrb.mxu1 %v308_v11  ;;  %v244_v43 = vld [vmem:[#allocation5 + $0x550] sm:$0xff]  ;;  %v245_v45 = vld [vmem:[#allocation5 + $0x558] sm:$0xff]  ;;  %v327_v7 = vld [vmem:[#allocation5 + $0x7e8] sm:$0xff] }
  0x36   :  { %470 = vmatpush.msrb.mxu2 %v181_v12  ;;  %493 = vmatpush.msrb.mxu3 %v309_v13  ;;  %v108_v46 = vld [vmem:[#allocation5 + $0x110] sm:$0xff]  ;;  %v109_v48 = vld [vmem:[#allocation5 + $0x118] sm:$0xff]  ;;  %v190_v10 = vld [vmem:[#allocation5 + $0x3a0] sm:$0xff] }
  0x37   :  { %425 = vmatpush.msrb.mxu0 %v172_v14  ;;  %448 = vmatpush.msrb.mxu1 %v300_v15  ;;  %v236_v47 = vld [vmem:[#allocation5 + $0x510] sm:$0xff]  ;;  %v237_v49 = vld [vmem:[#allocation5 + $0x518] sm:$0xff]  ;;  %v318_v11 = vld [vmem:[#allocation5 + $0x7a0] sm:$0xff] }
  0x38   :  { %471 = vmatpush.msrb.mxu2 %v173_v16  ;;  %494 = vmatpush.msrb.mxu3 %v301_v17  ;;  %v100_v50 = vld [vmem:[#allocation5 + $0xd0] sm:$0xff]  ;;  %v101_v52 = vld [vmem:[#allocation5 + $0xd8] sm:$0xff]  ;;  %v191_v12 = vld [vmem:[#allocation5 + $0x3a8] sm:$0xff] }
  0x39   :  { %346 = vmatmul.f32.vlgmr.msra.gmra.mxu0 %v1404_v8  ;;  %369 = vmatmul.f32.vlgmr.msra.gmra.mxu1 %v1406_v9  ;;  %v228_v51 = vld [vmem:[#allocation5 + $0x4d0] sm:$0xff]  ;;  %v229_v53 = vld [vmem:[#allocation5 + $0x4d8] sm:$0xff]  ;;  %v319_v13 = vld [vmem:[#allocation5 + $0x7a8] sm:$0xff] }
  0x3a   :  { %426 = vmatpush.msrb.mxu0 %v164_v18  ;;  %449 = vmatpush.msrb.mxu1 %v292_v19  ;;  %v1412_v54 = vld [vmem:[#allocation2 + $0x10] sm:$0xff]  ;;  %v1414_v55 = vld [vmem:[#allocation2 + $0x18] sm:$0xff]  ;;  %v182_v14 = vld [vmem:[#allocation5 + $0x360] sm:$0xff] }
  0x3b   :  { %472 = vmatpush.msrb.mxu2 %v165_v20  ;;  %495 = vmatpush.msrb.mxu3 %v293_v21  ;;  %v92_v56 = vld [vmem:[#allocation5 + $0x90] sm:$0xff]  ;;  %v93_v58 = vld [vmem:[#allocation5 + $0x98] sm:$0xff]  ;;  %v310_v15 = vld [vmem:[#allocation5 + $0x760] sm:$0xff] }
  0x3c   :  { %427 = vmatpush.msrb.mxu0 %v156_v22  ;;  %450 = vmatpush.msrb.mxu1 %v284_v23  ;;  %v220_v57 = vld [vmem:[#allocation5 + $0x490] sm:$0xff]  ;;  %v221_v59 = vld [vmem:[#allocation5 + $0x498] sm:$0xff]  ;;  %v183_v16 = vld [vmem:[#allocation5 + $0x368] sm:$0xff] }
  0x3d   :  { %473 = vmatpush.msrb.mxu2 %v157_v24  ;;  %496 = vmatpush.msrb.mxu3 %v285_v25  ;;  %v84_v60 = vld [vmem:[#allocation5 + $0x50] sm:$0xff]  ;;  %v85_v62 = vld [vmem:[#allocation5 + $0x58] sm:$0xff]  ;;  %v311_v17 = vld [vmem:[#allocation5 + $0x768] sm:$0xff] }
  0x3e   :  { %428 = vmatpush.msrb.mxu0 %v148_v26  ;;  %451 = vmatpush.msrb.mxu1 %v276_v27  ;;  %v212_v61 = vld [vmem:[#allocation5 + $0x450] sm:$0xff]  ;;  %v213_v63 = vld [vmem:[#allocation5 + $0x458] sm:$0xff]  ;;  %v174_v18 = vld [vmem:[#allocation5 + $0x320] sm:$0xff] }
  0x3f   :  { %474 = vmatpush.msrb.mxu2 %v149_v28  ;;  %497 = vmatpush.msrb.mxu3 %v277_v29  ;;  %v76_v0 = vld [vmem:[#allocation5 + $0x10] sm:$0xff]  ;;  %v77_v2 = vld [vmem:[#allocation5 + $0x18] sm:$0xff]  ;;  %v302_v19 = vld [vmem:[#allocation5 + $0x720] sm:$0xff] }
  0x40   :  { %429 = vmatpush.msrb.mxu0 %v140_v30  ;;  %452 = vmatpush.msrb.mxu1 %v268_v31  ;;  %v204_v1 = vld [vmem:[#allocation5 + $0x410] sm:$0xff]  ;;  %v205_v3 = vld [vmem:[#allocation5 + $0x418] sm:$0xff]  ;;  %v175_v20 = vld [vmem:[#allocation5 + $0x328] sm:$0xff] }
  0x41   :  { %475 = vmatpush.msrb.mxu2 %v141_v32  ;;  %498 = vmatpush.msrb.mxu3 %v269_v33  ;;  %v303_v21 = vld [vmem:[#allocation5 + $0x728] sm:$0xff]  ;;  %v166_v22 = vld [vmem:[#allocation5 + $0x2e0] sm:$0xff] }
  0x42   :  { %430 = vmatpush.msrb.mxu0 %v132_v34  ;;  %453 = vmatpush.msrb.mxu1 %v260_v35  ;;  %v294_v23 = vld [vmem:[#allocation5 + $0x6e0] sm:$0xff]  ;;  %v167_v24 = vld [vmem:[#allocation5 + $0x2e8] sm:$0xff] }
  0x43   :  { %476 = vmatpush.msrb.mxu2 %v133_v36  ;;  %499 = vmatpush.msrb.mxu3 %v261_v37  ;;  %v295_v25 = vld [vmem:[#allocation5 + $0x6e8] sm:$0xff]  ;;  %v158_v26 = vld [vmem:[#allocation5 + $0x2a0] sm:$0xff] }
  0x44   :  { %431 = vmatpush.msrb.mxu0 %v124_v38  ;;  %454 = vmatpush.msrb.mxu1 %v252_v39  ;;  %v286_v27 = vld [vmem:[#allocation5 + $0x6a0] sm:$0xff]  ;;  %v159_v28 = vld [vmem:[#allocation5 + $0x2a8] sm:$0xff] }
  0x45   :  { %477 = vmatpush.msrb.mxu2 %v125_v40  ;;  %500 = vmatpush.msrb.mxu3 %v253_v41  ;;  %v287_v29 = vld [vmem:[#allocation5 + $0x6a8] sm:$0xff]  ;;  %v150_v30 = vld [vmem:[#allocation5 + $0x260] sm:$0xff] }
  0x46   :  { %432 = vmatpush.msrb.mxu0 %v116_v42  ;;  %455 = vmatpush.msrb.mxu1 %v244_v43  ;;  %v278_v31 = vld [vmem:[#allocation5 + $0x660] sm:$0xff]  ;;  %v151_v32 = vld [vmem:[#allocation5 + $0x268] sm:$0xff] }
  0x47   :  { %478 = vmatpush.msrb.mxu2 %v117_v44  ;;  %501 = vmatpush.msrb.mxu3 %v245_v45  ;;  %v279_v33 = vld [vmem:[#allocation5 + $0x668] sm:$0xff]  ;;  %v142_v34 = vld [vmem:[#allocation5 + $0x220] sm:$0xff] }
  0x48   :  { %433 = vmatpush.msrb.mxu0 %v108_v46  ;;  %456 = vmatpush.msrb.mxu1 %v236_v47  ;;  %v270_v35 = vld [vmem:[#allocation5 + $0x620] sm:$0xff]  ;;  %v143_v36 = vld [vmem:[#allocation5 + $0x228] sm:$0xff] }
  0x49   :  { %479 = vmatpush.msrb.mxu2 %v109_v48  ;;  %502 = vmatpush.msrb.mxu3 %v237_v49  ;;  %v271_v37 = vld [vmem:[#allocation5 + $0x628] sm:$0xff]  ;;  %v134_v38 = vld [vmem:[#allocation5 + $0x1e0] sm:$0xff] }
  0x4a   :  { %434 = vmatpush.msrb.mxu0 %v100_v50  ;;  %457 = vmatpush.msrb.mxu1 %v228_v51  ;;  %v262_v39 = vld [vmem:[#allocation5 + $0x5e0] sm:$0xff]  ;;  %v135_v40 = vld [vmem:[#allocation5 + $0x1e8] sm:$0xff] }
  0x4b   :  { %480 = vmatpush.msrb.mxu2 %v101_v52  ;;  %503 = vmatpush.msrb.mxu3 %v229_v53  ;;  %v263_v41 = vld [vmem:[#allocation5 + $0x5e8] sm:$0xff]  ;;  %v126_v42 = vld [vmem:[#allocation5 + $0x1a0] sm:$0xff] }
  0x4c   :  { %395 = vmatmul.f32.gmra.mxu2 %v1412_v54  ;;  %418 = vmatmul.f32.gmra.mxu3 %v1414_v55  ;;  %v254_v43 = vld [vmem:[#allocation5 + $0x5a0] sm:$0xff]  ;;  %v127_v44 = vld [vmem:[#allocation5 + $0x1a8] sm:$0xff] }
  0x4d   :  { %435 = vmatpush.msrb.mxu0 %v92_v56  ;;  %458 = vmatpush.msrb.mxu1 %v220_v57  ;;  %v255_v45 = vld [vmem:[#allocation5 + $0x5a8] sm:$0xff]  ;;  %v118_v46 = vld [vmem:[#allocation5 + $0x160] sm:$0xff] }
  0x4e   :  { %481 = vmatpush.msrb.mxu2 %v93_v58  ;;  %504 = vmatpush.msrb.mxu3 %v221_v59  ;;  %v246_v47 = vld [vmem:[#allocation5 + $0x560] sm:$0xff]  ;;  %v119_v48 = vld [vmem:[#allocation5 + $0x168] sm:$0xff] }
  0x4f   :  { %436 = vmatpush.msrb.mxu0 %v84_v60  ;;  %459 = vmatpush.msrb.mxu1 %v212_v61  ;;  %v247_v49 = vld [vmem:[#allocation5 + $0x568] sm:$0xff]  ;;  %v110_v50 = vld [vmem:[#allocation5 + $0x120] sm:$0xff] }
  0x50   :  { %482 = vmatpush.msrb.mxu2 %v85_v62  ;;  %505 = vmatpush.msrb.mxu3 %v213_v63  ;;  %v238_v51 = vld [vmem:[#allocation5 + $0x520] sm:$0xff]  ;;  %v111_v52 = vld [vmem:[#allocation5 + $0x128] sm:$0xff] }
  0x51   :  { %349 = vmatmul.f32.gmra.mxu0 %v1412_v54  ;;  %372 = vmatmul.f32.gmra.mxu1 %v1414_v55  ;;  %v239_v53 = vld [vmem:[#allocation5 + $0x528] sm:$0xff]  ;;  %v102_v56 = vld [vmem:[#allocation5 + $0xe0] sm:$0xff] }
  0x52   :  { %437 = vmatpush.msrb.mxu0 %v76_v0  ;;  %460 = vmatpush.msrb.mxu1 %v204_v1  ;;  %v230_v57 = vld [vmem:[#allocation5 + $0x4e0] sm:$0xff]  ;;  %v103_v58 = vld [vmem:[#allocation5 + $0xe8] sm:$0xff] }
  0x53   :  { %483 = vmatpush.msrb.mxu2 %v77_v2  ;;  %506 = vmatpush.msrb.mxu3 %v205_v3  ;;  %v231_v59 = vld [vmem:[#allocation5 + $0x4e8] sm:$0xff]  ;;  %v94_v60 = vld [vmem:[#allocation5 + $0xa0] sm:$0xff] }
  0x54   :  { %514 = vmatpush.msra.mxu0 %v198_v4  ;;  %537 = vmatpush.msra.mxu1 %v326_v5  ;;  %v222_v61 = vld [vmem:[#allocation5 + $0x4a0] sm:$0xff]  ;;  %v95_v62 = vld [vmem:[#allocation5 + $0xa8] sm:$0xff] }
  0x55   :  { %560 = vmatpush.msra.mxu2 %v199_v6  ;;  %583 = vmatpush.msra.mxu3 %v327_v7  ;;  %v223_v63 = vld [vmem:[#allocation5 + $0x4a8] sm:$0xff]  ;;  %v86_v0 = vld [vmem:[#allocation5 + $0x60] sm:$0xff] }
  0x56   :  { %484 = vmatmul.f32.vlgmr.msrb.gmra.mxu2 %v1404_v8  ;;  %507 = vmatmul.f32.vlgmr.msrb.gmra.mxu3 %v1406_v9  ;;  %v214_v1 = vld [vmem:[#allocation5 + $0x460] sm:$0xff]  ;;  %v87_v2 = vld [vmem:[#allocation5 + $0x68] sm:$0xff] }
  0x57   :  { %515 = vmatpush.msra.mxu0 %v190_v10  ;;  %538 = vmatpush.msra.mxu1 %v318_v11  ;;  %v215_v3 = vld [vmem:[#allocation5 + $0x468] sm:$0xff]  ;;  %v78_v4 = vld [vmem:[#allocation5 + $0x20] sm:$0xff]  ;;  %v200_v10 = vld [vmem:[#allocation5 + $0x3f0] sm:$0xff] }
  0x58   :  { %561 = vmatpush.msra.mxu2 %v191_v12  ;;  %584 = vmatpush.msra.mxu3 %v319_v13  ;;  %v206_v5 = vld [vmem:[#allocation5 + $0x420] sm:$0xff]  ;;  %v79_v6 = vld [vmem:[#allocation5 + $0x28] sm:$0xff]  ;;  %v328_v11 = vld [vmem:[#allocation5 + $0x7f0] sm:$0xff] }
  0x59   :  { %516 = vmatpush.msra.mxu0 %v182_v14  ;;  %539 = vmatpush.msra.mxu1 %v310_v15  ;;  %v207_v7 = vld [vmem:[#allocation5 + $0x428] sm:$0xff]  ;;  %v201_v12 = vld [vmem:[#allocation5 + $0x3f8] sm:$0xff]  ;;  %v192_v14 = vld [vmem:[#allocation5 + $0x3b0] sm:$0xff] }
  0x5a   :  { %562 = vmatpush.msra.mxu2 %v183_v16  ;;  %585 = vmatpush.msra.mxu3 %v311_v17  ;;  %v329_v13 = vld [vmem:[#allocation5 + $0x7f8] sm:$0xff]  ;;  %v320_v15 = vld [vmem:[#allocation5 + $0x7b0] sm:$0xff] }
  0x5b   :  { %438 = vmatmul.f32.vlgmr.msrb.gmra.mxu0 %v1404_v8  ;;  %461 = vmatmul.f32.vlgmr.msrb.gmra.mxu1 %v1406_v9  ;;  %v193_v16 = vld [vmem:[#allocation5 + $0x3b8] sm:$0xff] }
  0x5c   :  { %517 = vmatpush.msra.mxu0 %v174_v18  ;;  %540 = vmatpush.msra.mxu1 %v302_v19  ;;  %v321_v17 = vld [vmem:[#allocation5 + $0x7b8] sm:$0xff]  ;;  %v184_v18 = vld [vmem:[#allocation5 + $0x370] sm:$0xff] }
  0x5d   :  { %563 = vmatpush.msra.mxu2 %v175_v20  ;;  %586 = vmatpush.msra.mxu3 %v303_v21  ;;  %v312_v19 = vld [vmem:[#allocation5 + $0x770] sm:$0xff]  ;;  %v185_v20 = vld [vmem:[#allocation5 + $0x378] sm:$0xff] }
  0x5e   :  { %518 = vmatpush.msra.mxu0 %v166_v22  ;;  %541 = vmatpush.msra.mxu1 %v294_v23  ;;  %v313_v21 = vld [vmem:[#allocation5 + $0x778] sm:$0xff]  ;;  %v176_v22 = vld [vmem:[#allocation5 + $0x330] sm:$0xff] }
  0x5f   :  { %564 = vmatpush.msra.mxu2 %v167_v24  ;;  %587 = vmatpush.msra.mxu3 %v295_v25  ;;  %v304_v23 = vld [vmem:[#allocation5 + $0x730] sm:$0xff]  ;;  %v177_v24 = vld [vmem:[#allocation5 + $0x338] sm:$0xff] }
  0x60   :  { %487 = vmatmul.f32.gmra.mxu2 %v1412_v54  ;;  %510 = vmatmul.f32.gmra.mxu3 %v1414_v55  ;;  %v305_v25 = vld [vmem:[#allocation5 + $0x738] sm:$0xff] }
  0x61   :  { %519 = vmatpush.msra.mxu0 %v158_v26  ;;  %542 = vmatpush.msra.mxu1 %v286_v27  ;;  %v168_v26 = vld [vmem:[#allocation5 + $0x2f0] sm:$0xff] }
  0x62   :  { %565 = vmatpush.msra.mxu2 %v159_v28  ;;  %588 = vmatpush.msra.mxu3 %v287_v29  ;;  %v296_v27 = vld [vmem:[#allocation5 + $0x6f0] sm:$0xff]  ;;  %v169_v28 = vld [vmem:[#allocation5 + $0x2f8] sm:$0xff] }
  0x63   :  { %520 = vmatpush.msra.mxu0 %v150_v30  ;;  %543 = vmatpush.msra.mxu1 %v278_v31  ;;  %v297_v29 = vld [vmem:[#allocation5 + $0x6f8] sm:$0xff]  ;;  %v160_v30 = vld [vmem:[#allocation5 + $0x2b0] sm:$0xff] }
  0x64   :  { %566 = vmatpush.msra.mxu2 %v151_v32  ;;  %589 = vmatpush.msra.mxu3 %v279_v33  ;;  %v288_v31 = vld [vmem:[#allocation5 + $0x6b0] sm:$0xff]  ;;  %v161_v32 = vld [vmem:[#allocation5 + $0x2b8] sm:$0xff] }
  0x65   :  { %441 = vmatmul.f32.gmra.mxu0 %v1412_v54  ;;  %464 = vmatmul.f32.gmra.mxu1 %v1414_v55  ;;  %v289_v33 = vld [vmem:[#allocation5 + $0x6b8] sm:$0xff] }
  0x66   :  { %521 = vmatpush.msra.mxu0 %v142_v34  ;;  %544 = vmatpush.msra.mxu1 %v270_v35  ;;  %v152_v34 = vld [vmem:[#allocation5 + $0x270] sm:$0xff] }
  0x67   :  { %567 = vmatpush.msra.mxu2 %v143_v36  ;;  %590 = vmatpush.msra.mxu3 %v271_v37  ;;  %v280_v35 = vld [vmem:[#allocation5 + $0x670] sm:$0xff]  ;;  %v153_v36 = vld [vmem:[#allocation5 + $0x278] sm:$0xff] }
  0x68   :  { %522 = vmatpush.msra.mxu0 %v134_v38  ;;  %545 = vmatpush.msra.mxu1 %v262_v39  ;;  %v281_v37 = vld [vmem:[#allocation5 + $0x678] sm:$0xff]  ;;  %v144_v38 = vld [vmem:[#allocation5 + $0x230] sm:$0xff] }
  0x69   :  { %568 = vmatpush.msra.mxu2 %v135_v40  ;;  %591 = vmatpush.msra.mxu3 %v263_v41  ;;  %v272_v39 = vld [vmem:[#allocation5 + $0x630] sm:$0xff]  ;;  %v145_v40 = vld [vmem:[#allocation5 + $0x238] sm:$0xff] }
  0x6a   :  { %523 = vmatpush.msra.mxu0 %v126_v42  ;;  %546 = vmatpush.msra.mxu1 %v254_v43  ;;  %v273_v41 = vld [vmem:[#allocation5 + $0x638] sm:$0xff]  ;;  %v136_v42 = vld [vmem:[#allocation5 + $0x1f0] sm:$0xff] }
  0x6b   :  { %569 = vmatpush.msra.mxu2 %v127_v44  ;;  %592 = vmatpush.msra.mxu3 %v255_v45  ;;  %v264_v43 = vld [vmem:[#allocation5 + $0x5f0] sm:$0xff]  ;;  %v137_v44 = vld [vmem:[#allocation5 + $0x1f8] sm:$0xff] }
  0x6c   :  { %524 = vmatpush.msra.mxu0 %v118_v46  ;;  %547 = vmatpush.msra.mxu1 %v246_v47  ;;  %v265_v45 = vld [vmem:[#allocation5 + $0x5f8] sm:$0xff]  ;;  %v128_v46 = vld [vmem:[#allocation5 + $0x1b0] sm:$0xff] }
  0x6d   :  { %570 = vmatpush.msra.mxu2 %v119_v48  ;;  %593 = vmatpush.msra.mxu3 %v247_v49  ;;  %v256_v47 = vld [vmem:[#allocation5 + $0x5b0] sm:$0xff]  ;;  %v129_v48 = vld [vmem:[#allocation5 + $0x1b8] sm:$0xff] }
  0x6e   :  { %525 = vmatpush.msra.mxu0 %v110_v50  ;;  %548 = vmatpush.msra.mxu1 %v238_v51  ;;  %v257_v49 = vld [vmem:[#allocation5 + $0x5b8] sm:$0xff]  ;;  %v120_v50 = vld [vmem:[#allocation5 + $0x170] sm:$0xff] }
  0x6f   :  { %571 = vmatpush.msra.mxu2 %v111_v52  ;;  %594 = vmatpush.msra.mxu3 %v239_v53  ;;  %v248_v51 = vld [vmem:[#allocation5 + $0x570] sm:$0xff]  ;;  %v121_v52 = vld [vmem:[#allocation5 + $0x178] sm:$0xff] }
  0x70   :  { %526 = vmatpush.msra.mxu0 %v102_v56  ;;  %549 = vmatpush.msra.mxu1 %v230_v57  ;;  %v249_v53 = vld [vmem:[#allocation5 + $0x578] sm:$0xff]  ;;  %v112_v56 = vld [vmem:[#allocation5 + $0x130] sm:$0xff] }
  0x71   :  { %572 = vmatpush.msra.mxu2 %v103_v58  ;;  %595 = vmatpush.msra.mxu3 %v231_v59  ;;  %v240_v57 = vld [vmem:[#allocation5 + $0x530] sm:$0xff]  ;;  %v113_v58 = vld [vmem:[#allocation5 + $0x138] sm:$0xff] }
  0x72   :  { %527 = vmatpush.msra.mxu0 %v94_v60  ;;  %550 = vmatpush.msra.mxu1 %v222_v61  ;;  %v241_v59 = vld [vmem:[#allocation5 + $0x538] sm:$0xff]  ;;  %v104_v60 = vld [vmem:[#allocation5 + $0xf0] sm:$0xff] }
  0x73   :  { %573 = vmatpush.msra.mxu2 %v95_v62  ;;  %596 = vmatpush.msra.mxu3 %v223_v63  ;;  %v232_v61 = vld [vmem:[#allocation5 + $0x4f0] sm:$0xff]  ;;  %v105_v62 = vld [vmem:[#allocation5 + $0xf8] sm:$0xff] }
  0x74   :  { %528 = vmatpush.msra.mxu0 %v86_v0  ;;  %551 = vmatpush.msra.mxu1 %v214_v1  ;;  %v233_v63 = vld [vmem:[#allocation5 + $0x4f8] sm:$0xff]  ;;  %v96_v0 = vld [vmem:[#allocation5 + $0xb0] sm:$0xff] }
  0x75   :  { %574 = vmatpush.msra.mxu2 %v87_v2  ;;  %597 = vmatpush.msra.mxu3 %v215_v3  ;;  %v224_v1 = vld [vmem:[#allocation5 + $0x4b0] sm:$0xff]  ;;  %v97_v2 = vld [vmem:[#allocation5 + $0xb8] sm:$0xff] }
  0x76   :  { %529 = vmatpush.msra.mxu0 %v78_v4  ;;  %552 = vmatpush.msra.mxu1 %v206_v5  ;;  %v225_v3 = vld [vmem:[#allocation5 + $0x4b8] sm:$0xff]  ;;  %v88_v4 = vld [vmem:[#allocation5 + $0x70] sm:$0xff] }
  0x77   :  { %575 = vmatpush.msra.mxu2 %v79_v6  ;;  %598 = vmatpush.msra.mxu3 %v207_v7  ;;  %v216_v5 = vld [vmem:[#allocation5 + $0x470] sm:$0xff]  ;;  %v89_v6 = vld [vmem:[#allocation5 + $0x78] sm:$0xff] }
  0x78   :  { %530 = vmatmul.f32.vlgmr.msra.gmra.mxu0 %v1404_v8  ;;  %553 = vmatmul.f32.vlgmr.msra.gmra.mxu1 %v1406_v9  ;;  %v217_v7 = vld [vmem:[#allocation5 + $0x478] sm:$0xff] }
  0x79   :  { %576 = vmatmul.f32.vlgmr.msra.gmra.mxu2 %v1404_v8  ;;  %599 = vmatmul.f32.vlgmr.msra.gmra.mxu3 %v1406_v9 }
  0x7a   :  { %606 = vmatpush.msrb.mxu0 %v200_v10  ;;  %629 = vmatpush.msrb.mxu1 %v328_v11  ;;  %v80_v10 = vld [vmem:[#allocation5 + $0x30] sm:$0xff] }
  0x7b   :  { %652 = vmatpush.msrb.mxu2 %v201_v12  ;;  %675 = vmatpush.msrb.mxu3 %v329_v13  ;;  %v208_v11 = vld [vmem:[#allocation5 + $0x430] sm:$0xff]  ;;  %v81_v12 = vld [vmem:[#allocation5 + $0x38] sm:$0xff] }
  0x7c   :  { %607 = vmatpush.msrb.mxu0 %v192_v14  ;;  %630 = vmatpush.msrb.mxu1 %v320_v15  ;;  %v209_v13 = vld [vmem:[#allocation5 + $0x438] sm:$0xff]  ;;  %v900_v14 = vld [vmem:[#allocation7 + $0xf0] sm:$0xff]  ;;  %v898_v15 = vld [vmem:[#allocation7 + $0xe0] sm:$0xff] }
  0x7d   :  { %653 = vmatpush.msrb.mxu2 %v193_v16  ;;  %676 = vmatpush.msrb.mxu3 %v321_v17  ;;  %v896_v16 = vld [vmem:[#allocation7 + $0xd0] sm:$0xff]  ;;  %v894_v17 = vld [vmem:[#allocation7 + $0xc0] sm:$0xff] }
  0x7e   :  { %608 = vmatpush.msrb.mxu0 %v184_v18  ;;  %631 = vmatpush.msrb.mxu1 %v312_v19  ;;  %v932_v18 = vld [vmem:[#allocation7 + $0x1f0] sm:$0xff]  ;;  %v890_v19 = vld [vmem:[#allocation7 + $0xa0] sm:$0xff] }
  0x7f   :  { %654 = vmatpush.msrb.mxu2 %v185_v20  ;;  %677 = vmatpush.msrb.mxu3 %v313_v21  ;;  %v928_v20 = vld [vmem:[#allocation7 + $0x1d0] sm:$0xff] }
  0x80   :  { %609 = vmatpush.msrb.mxu0 %v176_v22  ;;  %632 = vmatpush.msrb.mxu1 %v304_v23  ;;  %v888_v21 = vld [vmem:[#allocation7 + $0x90] sm:$0xff]  ;;  %v926_v22 = vld [vmem:[#allocation7 + $0x1c0] sm:$0xff] }
  0x81   :  { %655 = vmatpush.msrb.mxu2 %v177_v24  ;;  %678 = vmatpush.msrb.mxu3 %v305_v25  ;;  %v886_v23 = vld [vmem:[#allocation7 + $0x80] sm:$0xff]  ;;  %v924_v24 = vld [vmem:[#allocation7 + $0x1b0] sm:$0xff] }
  0x82   :  { %533 = vmatmul.f32.gmra.mxu0 %v1412_v54  ;;  %556 = vmatmul.f32.gmra.mxu1 %v1414_v55 }
  0x83   :  { %579 = vmatmul.f32.gmra.mxu2 %v1412_v54  ;;  %602 = vmatmul.f32.gmra.mxu3 %v1414_v55 }
  0x84   :  { %610 = vmatpush.msrb.mxu0 %v168_v26  ;;  %633 = vmatpush.msrb.mxu1 %v296_v27  ;;  %v884_v26 = vld [vmem:[#allocation7 + $0x70] sm:$0xff]  ;;  %v922_v27 = vld [vmem:[#allocation7 + $0x1a0] sm:$0xff] }
  0x85   :  { %656 = vmatpush.msrb.mxu2 %v169_v28  ;;  %679 = vmatpush.msrb.mxu3 %v297_v29 }
  0x86   :  { %611 = vmatpush.msrb.mxu0 %v160_v30  ;;  %634 = vmatpush.msrb.mxu1 %v288_v31  ;;  %v882_v30 = vld [vmem:[#allocation7 + $0x60] sm:$0xff]  ;;  %v920_v31 = vld [vmem:[#allocation7 + $0x190] sm:$0xff] }
  0x87   :  { %657 = vmatpush.msrb.mxu2 %v161_v32  ;;  %680 = vmatpush.msrb.mxu3 %v289_v33 }
  0x88   :  { %612 = vmatpush.msrb.mxu0 %v152_v34  ;;  %635 = vmatpush.msrb.mxu1 %v280_v35  ;;  %v880_v34 = vld [vmem:[#allocation7 + $0x50] sm:$0xff]  ;;  %v918_v35 = vld [vmem:[#allocation7 + $0x180] sm:$0xff] }
  0x89   :  { %658 = vmatpush.msrb.mxu2 %v153_v36  ;;  %681 = vmatpush.msrb.mxu3 %v281_v37  ;;  %v878_v36 = vld [vmem:[#allocation7 + $0x40] sm:$0xff]  ;;  %v916_v37 = vld [vmem:[#allocation7 + $0x170] sm:$0xff] }
  0x8a   :  { %613 = vmatpush.msrb.mxu0 %v144_v38  ;;  %636 = vmatpush.msrb.mxu1 %v272_v39  ;;  %v876_v39 = vld [vmem:[#allocation7 + $0x30] sm:$0xff] }
  0x8b   :  { %659 = vmatpush.msrb.mxu2 %v145_v40  ;;  %682 = vmatpush.msrb.mxu3 %v273_v41  ;;  %v914_v40 = vld [vmem:[#allocation7 + $0x160] sm:$0xff] }
  0x8c   :  { %614 = vmatpush.msrb.mxu0 %v136_v42  ;;  %637 = vmatpush.msrb.mxu1 %v264_v43  ;;  %v874_v41 = vld [vmem:[#allocation7 + $0x20] sm:$0xff]  ;;  %v912_v42 = vld [vmem:[#allocation7 + $0x150] sm:$0xff] }
  0x8d   :  { %660 = vmatpush.msrb.mxu2 %v137_v44  ;;  %683 = vmatpush.msrb.mxu3 %v265_v45  ;;  %v872_v43 = vld [vmem:[#allocation7 + $0x10] sm:$0xff]  ;;  %v910_v44 = vld [vmem:[#allocation7 + $0x140] sm:$0xff] }
  0x8e   :  { %615 = vmatpush.msrb.mxu0 %v128_v46  ;;  %638 = vmatpush.msrb.mxu1 %v256_v47 }
  0x8f   :  { %661 = vmatpush.msrb.mxu2 %v129_v48  ;;  %684 = vmatpush.msrb.mxu3 %v257_v49  ;;  %v870_v49 = vld [vmem:[#allocation7] sm:$0xff] }
  0x90   :  { %616 = vmatpush.msrb.mxu0 %v120_v50  ;;  %639 = vmatpush.msrb.mxu1 %v248_v51  ;;  %v908_v50 = vld [vmem:[#allocation7 + $0x130] sm:$0xff] }
  0x91   :  { %662 = vmatpush.msrb.mxu2 %v121_v52  ;;  %685 = vmatpush.msrb.mxu3 %v249_v53  ;;  %v964_v53 = vld [vmem:[#allocation7 + $0x2f0] sm:$0xff] }
  0x92   :  { %617 = vmatpush.msrb.mxu0 %v112_v56  ;;  %640 = vmatpush.msrb.mxu1 %v240_v57  ;;  %v901_v56 = vld [vmem:[#allocation7 + $0xf8] sm:$0xff] }
  0x93   :  { %663 = vmatpush.msrb.mxu2 %v113_v58  ;;  %686 = vmatpush.msrb.mxu3 %v241_v59  ;;  %v906_v59 = vld [vmem:[#allocation7 + $0x120] sm:$0xff] }
  0x94   :  { %618 = vmatpush.msrb.mxu0 %v104_v60  ;;  %641 = vmatpush.msrb.mxu1 %v232_v61  ;;  %v962_v60 = vld [vmem:[#allocation7 + $0x2e0] sm:$0xff]  ;;  %v899_v61 = vld [vmem:[#allocation7 + $0xe8] sm:$0xff] }
  0x95   :  { %664 = vmatpush.msrb.mxu2 %v105_v62  ;;  %687 = vmatpush.msrb.mxu3 %v233_v63 }
  0x96   :  { %619 = vmatpush.msrb.mxu0 %v96_v0  ;;  %642 = vmatpush.msrb.mxu1 %v224_v1  ;;  %v904_v0 = vld [vmem:[#allocation7 + $0x110] sm:$0xff] }
  0x97   :  { %665 = vmatpush.msrb.mxu2 %v97_v2  ;;  %688 = vmatpush.msrb.mxu3 %v225_v3  ;;  %v960_v1 = vld [vmem:[#allocation7 + $0x2d0] sm:$0xff]  ;;  %v897_v2 = vld [vmem:[#allocation7 + $0xd8] sm:$0xff]  ;;  %v902_v3 = vld [vmem:[#allocation7 + $0x100] sm:$0xff] }
  0x98   :  { %620 = vmatpush.msrb.mxu0 %v88_v4  ;;  %643 = vmatpush.msrb.mxu1 %v216_v5  ;;  %v958_v5 = vld [vmem:[#allocation7 + $0x2c0] sm:$0xff] }
  0x99   :  { %666 = vmatpush.msrb.mxu2 %v89_v6  ;;  %689 = vmatpush.msrb.mxu3 %v217_v7  ;;  %v996_v6 = vld [vmem:[#allocation7 + $0x3f0] sm:$0xff]  ;;  %v895_v7 = vld [vmem:[#allocation7 + $0xc8] sm:$0xff] }
  0x9a   :  { %621 = vmatpush.msrb.mxu0 %v80_v10  ;;  %644 = vmatpush.msrb.mxu1 %v208_v11  ;;  %v933_v11 = vld [vmem:[#allocation7 + $0x1f8] sm:$0xff] }
  0x9b   :  { %667 = vmatpush.msrb.mxu2 %v81_v12  ;;  %690 = vmatpush.msrb.mxu3 %v209_v13  ;;  %v956_v12 = vld [vmem:[#allocation7 + $0x2b0] sm:$0xff]  ;;  %v994_v13 = vld [vmem:[#allocation7 + $0x3e0] sm:$0xff] }
  0x9c   :  { %622 = vmatmul.f32.vlgmr.msrb.gmra.mxu0 %v1404_v8  ;;  %645 = vmatmul.f32.vlgmr.msrb.gmra.mxu1 %v1406_v9 }
  0x9d   :  { %668 = vmatmul.f32.vlgmr.msrb.gmra.mxu2 %v1404_v8  ;;  %691 = vmatmul.f32.vlgmr.msrb.gmra.mxu3 %v1406_v9  ;;  %v892_v8 = vld [vmem:[#allocation7 + $0xb0] sm:$0xff]  ;;  %v930_v9 = vld [vmem:[#allocation7 + $0x1e0] sm:$0xff] }
  0x9e   :  { %998 = vmatpush.msra.mxu0 %v900_v14  ;;  %1021 = vmatpush.msra.mxu1 %v932_v18  ;;  %v893_v14 = vld [vmem:[#allocation7 + $0xb8] sm:$0xff]  ;;  %v992_v18 = vld [vmem:[#allocation7 + $0x3d0] sm:$0xff] }
  0x9f   :  { %1044 = vmatpush.msra.mxu2 %v964_v53  ;;  %1067 = vmatpush.msra.mxu3 %v996_v6  ;;  %v976_v6 = vld [vmem:[#allocation7 + $0x350] sm:$0xff] }
  0xa0   :  { %999 = vmatpush.msra.mxu0 %v898_v15  ;;  %1022 = vmatpush.msra.mxu1 %v930_v9  ;;  %v931_v15 = vld [vmem:[#allocation7 + $0x1e8] sm:$0xff] }
  0xa1   :  { %1045 = vmatpush.msra.mxu2 %v962_v60  ;;  %1068 = vmatpush.msra.mxu3 %v994_v13  ;;  %v940_v60 = vld [vmem:[#allocation7 + $0x230] sm:$0xff] }
  0xa2   :  { %1000 = vmatpush.msra.mxu0 %v896_v16  ;;  %1023 = vmatpush.msra.mxu1 %v928_v20  ;;  %v952_v20 = vld [vmem:[#allocation7 + $0x290] sm:$0xff] }
  0xa3   :  { %1046 = vmatpush.msra.mxu2 %v960_v1  ;;  %1069 = vmatpush.msra.mxu3 %v992_v18 }
  0xa4   :  { %625 = vmatmul.f32.gmra.mxu0 %v1412_v54  ;;  %648 = vmatmul.f32.gmra.mxu1 %v1414_v55 }
  0xa5   :  { %671 = vmatmul.f32.gmra.mxu2 %v1412_v54  ;;  %694 = vmatmul.f32.gmra.mxu3 %v1414_v55 }
  0xa6   :  { %1001 = vmatpush.msra.mxu0 %v894_v17  ;;  %1024 = vmatpush.msra.mxu1 %v926_v22  ;;  %v954_v17 = vld [vmem:[#allocation7 + $0x2a0] sm:$0xff]  ;;  %v927_v22 = vld [vmem:[#allocation7 + $0x1c8] sm:$0xff] }
  0xa7   :  { %1047 = vmatpush.msra.mxu2 %v958_v5  ;;  %v938_v5 = vld [vmem:[#allocation7 + $0x220] sm:$0xff] }
  0xa8   :  { %1002 = vmatpush.msra.mxu0 %v892_v8  ;;  %1025 = vmatpush.msra.mxu1 %v924_v24  ;;  %v891_v8 = vld [vmem:[#allocation7 + $0xa8] sm:$0xff]  ;;  %v950_v24 = vld [vmem:[#allocation7 + $0x280] sm:$0xff] }
  0xa9   :  { %1048 = vmatpush.msra.mxu2 %v956_v12  ;;  %v913_v12 = vld [vmem:[#allocation7 + $0x158] sm:$0xff] }
  0xaa   :  { %1003 = vmatpush.msra.mxu0 %v890_v19  ;;  %1026 = vmatpush.msra.mxu1 %v922_v27  ;;  %v929_v19 = vld [vmem:[#allocation7 + $0x1d8] sm:$0xff]  ;;  %v887_v27 = vld [vmem:[#allocation7 + $0x88] sm:$0xff] }
  0xab   :  { %1049 = vmatpush.msra.mxu2 %v954_v17  ;;  %v974_v17 = vld [vmem:[#allocation7 + $0x340] sm:$0xff] }
  0xac   :  { %1004 = vmatpush.msra.mxu0 %v888_v21  ;;  %1027 = vmatpush.msra.mxu1 %v920_v31  ;;  %v986_v31 = vld [vmem:[#allocation7 + $0x3a0] sm:$0xff] }
  0xad   :  { %1050 = vmatpush.msra.mxu2 %v952_v20  ;;  %v873_v20 = vld [vmem:[#allocation7 + $0x18] sm:$0xff] }
  0xae   :  { %1005 = vmatpush.msra.mxu0 %v886_v23  ;;  %1028 = vmatpush.msra.mxu1 %v918_v35 }
  0xaf   :  { %1051 = vmatpush.msra.mxu2 %v950_v24 }
  0xb0   :  { %1006 = vmatpush.msra.mxu0 %v884_v26  ;;  %1029 = vmatpush.msra.mxu1 %v916_v37  ;;  %v988_v26 = vld [vmem:[#allocation7 + $0x3b0] sm:$0xff]  ;;  %v923_v37 = vld [vmem:[#allocation7 + $0x1a8] sm:$0xff] }
  0xb2   :  { %1007 = vmatpush.msra.mxu0 %v882_v30  ;;  %1030 = vmatpush.msra.mxu1 %v914_v40  ;;  %v948_v30 = vld [vmem:[#allocation7 + $0x270] sm:$0xff] }
  0xb3   :  { %1052 = vmatpush.msra.mxu2 %v948_v30  ;;  %v984_v40 = vld [vmem:[#allocation7 + $0x390] sm:$0xff] }
  0xb4   :  { %1008 = vmatpush.msra.mxu0 %v880_v34  ;;  %1031 = vmatpush.msra.mxu1 %v912_v42  ;;  %v921_v42 = vld [vmem:[#allocation7 + $0x198] sm:$0xff] }
  0xb6   :  { %v347_v54 = vpop.f32.mrf.mxu0  ;;  %v370_v55 = vpop.f32.mrf.mxu1  ;;  %1009 = vmatpush.msra.mxu0 %v878_v36  ;;  %1032 = vmatpush.msra.mxu1 %v910_v44  ;;  %v982_v44 = vld [vmem:[#allocation7 + $0x380] sm:$0xff] }
  0xb7   :  { %v1444_v25 = vadd.f32 %v370_v55, %v347_v54  ;;  %v393_v28 = vpop.f32.mrf.mxu2  ;;  %v416_v29 = vpop.f32.mrf.mxu3  ;;  %v990_v54 = vld [vmem:[#allocation7 + $0x3c0] sm:$0xff]  ;;  %v889_v55 = vld [vmem:[#allocation7 + $0x98] sm:$0xff] }
  0xb8   :  { %v1447_v33 = vadd.f32 %v416_v29, %v393_v28  ;;  %1010 = vmatpush.msra.mxu0 %v876_v39  ;;  %1033 = vmatpush.msra.mxu1 %v908_v50  ;;  %v925_v28 = vld [vmem:[#allocation7 + $0x1b8] sm:$0xff]  ;;  %v946_v39 = vld [vmem:[#allocation7 + $0x260] sm:$0xff] }
  0xb9   :  { %v1210_v32 = vmul.f32 -1.442695, %v1444_v25  ;;  %1070 = vmatpush.msra.mxu3 %v990_v54  ;;  %1053 = vmatpush.msra.mxu2 %v946_v39  ;;  %v942_v50 = vld [vmem:[#allocation7 + $0x240] sm:$0xff]  ;;  %v911_v54 = vld [vmem:[#allocation7 + $0x148] sm:$0xff] }
  0xba   :  { %v1211_v38 = vmul.f32 -1.442695, %v1447_v33  ;;  %1011 = vmatpush.msra.mxu0 %v874_v41  ;;  %1034 = vmatpush.msra.mxu1 %v906_v59  ;;  %v883_v41 = vld [vmem:[#allocation7 + $0x68] sm:$0xff] }
  0xbb   :  { %1227 = vpow2.f32 %v1210_v32  ;;  %1071 = vmatpush.msra.mxu3 %v988_v26  ;;  %v885_v32 = vld [vmem:[#allocation7 + $0x78] sm:$0xff]  ;;  %v907_v39 = vld [vmem:[#allocation7 + $0x128] sm:$0xff] }
  0xbc   :  { %1229 = vpow2.f32 %v1211_v38  ;;  %1012 = vmatpush.msra.mxu0 %v872_v43  ;;  %1035 = vmatpush.msra.mxu1 %v904_v0  ;;  %v944_v43 = vld [vmem:[#allocation7 + $0x250] sm:$0xff] }
  0xbd   :  { %1072 = vmatpush.msra.mxu3 %v986_v31  ;;  %1054 = vmatpush.msra.mxu2 %v944_v43 }
  0xbe   :  { %1013 = vmatpush.msra.mxu0 %v870_v49  ;;  %1036 = vmatpush.msra.mxu1 %v902_v3  ;;  %v919_v49 = vld [vmem:[#allocation7 + $0x188] sm:$0xff] }
  0xbf   :  { %1073 = vmatpush.msra.mxu3 %v984_v40  ;;  %1055 = vmatpush.msra.mxu2 %v942_v50  ;;  %v915_v3 = vld [vmem:[#allocation7 + $0x168] sm:$0xff] }
  0xc0   :  { %1090 = vmatpush.msrb.mxu0 %v901_v56  ;;  %1113 = vmatpush.msrb.mxu1 %v933_v11  ;;  %v879_v56 = vld [vmem:[#allocation7 + $0x48] sm:$0xff] }
  0xc1   :  { %v1228_v45 = vpop.eup %1227  ;;  %1074 = vmatpush.msra.mxu3 %v982_v44  ;;  %1056 = vmatpush.msra.mxu2 %v940_v60  ;;  %v875_v11 = vld [vmem:[#allocation7 + $0x28] sm:$0xff] }
  0xc2   :  { %v1452_v57 = vadd.f32 1.0, %v1228_v45  ;;  %v1230_v62 = vpop.eup %1229  ;;  %1091 = vmatpush.msrb.mxu0 %v899_v61  ;;  %1114 = vmatpush.msrb.mxu1 %v931_v15  ;;  %v978_v61 = vld [vmem:[#allocation7 + $0x360] sm:$0xff] }
  0xc3   :  { %v1458_v4 = vadd.f32 1.0, %v1230_v62  ;;  %v877_v62 = vld [vmem:[#allocation7 + $0x38] sm:$0xff]  ;;  %1057 = vmatpush.msra.mxu2 %v938_v5 }
  0xc4   :  { %1092 = vmatpush.msrb.mxu0 %v897_v2  ;;  %1115 = vmatpush.msrb.mxu1 %v929_v19  ;;  %vm735_vm0 = vweird.f32 %v1452_v57 }
  0xc5   :  { %vm750_vm3 = vweird.f32 %v1458_v4 }
  0xc6   :  { %1093 = vmatpush.msrb.mxu0 %v895_v7  ;;  %1116 = vmatpush.msrb.mxu1 %v927_v22  ;;  %v739_v7 = vand.u32 2147483647, %v1452_v57  ;;  %v934_v22 = vld [vmem:[#allocation7 + $0x200] sm:$0xff] }
  0xc8   :  { %1094 = vmatpush.msrb.mxu0 %v893_v14  ;;  %1117 = vmatpush.msrb.mxu1 %v925_v28  ;;  %vm1499_vm4 = vcmp.eq.f32.partialorder %v739_v7, 8.507059e+37  ;;  %v909_v28 = vld [vmem:[#allocation7 + $0x138] sm:$0xff] }
  0xca   :  { %1095 = vmatpush.msrb.mxu0 %v891_v8  ;;  %1118 = vmatpush.msrb.mxu1 %v923_v37  ;;  %v754_v37 = vand.u32 2147483647, %v1458_v4 }
  0xcc   :  { %1096 = vmatpush.msrb.mxu0 %v889_v55  ;;  %1119 = vmatpush.msrb.mxu1 %v921_v42  ;;  %vm1531_vm7 = vcmp.eq.f32.partialorder %v754_v37, 8.507059e+37  ;;  %v989_v37 = vld [vmem:[#allocation7 + $0x3b8] sm:$0xff] }
  0xce   :  { %v350_v46 = vpop.f32.mrf.mxu0  ;;  %v373_v47 = vpop.f32.mrf.mxu1  ;;  %1097 = vmatpush.msrb.mxu0 %v887_v27  ;;  %1120 = vmatpush.msrb.mxu1 %v919_v49  ;;  %v871_v27 = vld [vmem:[#allocation7 + $0x8] sm:$0xff] }
  0xcf   :  { %v1450_v48 = vadd.f32 %v373_v47, %v350_v46  ;;  %v396_v51 = vpop.f32.mrf.mxu2  ;;  %v419_v52 = vpop.f32.mrf.mxu3  ;;  %v881_v47 = vld [vmem:[#allocation7 + $0x58] sm:$0xff] }
  0xd0   :  { %v1455_v63 = vadd.f32 %v419_v52, %v396_v51  ;;  %1098 = vmatpush.msrb.mxu0 %v885_v32  ;;  %v980_v51 = vld [vmem:[#allocation7 + $0x370] sm:$0xff] }
  0xd1   :  { %v1214_v58 = vmul.f32 -1.442695, %v1450_v48  ;;  %1075 = vmatpush.msra.mxu3 %v980_v51 }
  0xd2   :  { %v1215_v10 = vmul.f32 -1.442695, %v1455_v63  ;;  %1099 = vmatpush.msrb.mxu0 %v883_v41  ;;  %v968_v41 = vld [vmem:[#allocation7 + $0x310] sm:$0xff] }
  0xd3   :  { %1231 = vpow2.f32 %v1214_v58  ;;  %v917_v58 = vld [vmem:[#allocation7 + $0x178] sm:$0xff]  ;;  %1076 = vmatpush.msra.mxu3 %v978_v61  ;;  %v903_v61 = vld [vmem:[#allocation7 + $0x108] sm:$0xff] }
  0xd4   :  { %1233 = vrcp.f32 %v1452_v57  ;;  %1100 = vmatpush.msrb.mxu0 %v881_v47  ;;  %1121 = vmatpush.msrb.mxu1 %v917_v58  ;;  %v905_v47 = vld [vmem:[#allocation7 + $0x118] sm:$0xff] }
  0xd5   :  { %1235 = vrcp.f32 %v1458_v4  ;;  %1077 = vmatpush.msra.mxu3 %v976_v6 }
  0xd6   :  { %1237 = vpow2.f32 %v1215_v10  ;;  %1101 = vmatpush.msrb.mxu0 %v879_v56  ;;  %v741_v10 = vand.u32 2147483648, %v1452_v57  ;;  %1122 = vmatpush.msrb.mxu1 %v915_v3  ;;  %v966_v56 = vld [vmem:[#allocation7 + $0x300] sm:$0xff]  ;;  %v959_v3 = vld [vmem:[#allocation7 + $0x2c8] sm:$0xff] }
  0xd7   :  { %1078 = vmatpush.msra.mxu3 %v974_v17 }
  0xd8   :  { %v439_v35 = vpop.f32.mrf.mxu0  ;;  %v462_v36 = vpop.f32.mrf.mxu1  ;;  %1102 = vmatpush.msrb.mxu0 %v877_v62  ;;  %1123 = vmatpush.msrb.mxu1 %v913_v12  ;;  %v742_v24 = vor.u32 1.1754944e-38, %v741_v10  ;;  %v997_v62 = vld [vmem:[#allocation7 + $0x3f8] sm:$0xff] }
  0xd9   :  { %v1232_v16 = vpop.eup %1231  ;;  %v1476_v53 = vadd.f32 %v462_v36, %v439_v35  ;;  %v485_v1 = vpop.f32.mrf.mxu2  ;;  %v965_v35 = vld [vmem:[#allocation7 + $0x2f8] sm:$0xff]  ;;  %v970_v36 = vld [vmem:[#allocation7 + $0x320] sm:$0xff] }
  0xda   :  { %v1462_v9 = vpop.eup %1233  ;;  %v1464_v21 = vadd.f32 1.0, %v1232_v16  ;;  %v508_v2 = vpop.f32.mrf.mxu3  ;;  %v936_v16 = vld [vmem:[#allocation7 + $0x210] sm:$0xff]  ;;  %1103 = vmatpush.msrb.mxu0 %v875_v11  ;;  %1124 = vmatpush.msrb.mxu1 %v911_v54  ;;  %v993_v54 = vld [vmem:[#allocation7 + $0x3d8] sm:$0xff] }
  0xdb   :  { %v731_v23 = vmul.f32 %v1462_v9, %v1452_v57  ;;  %v1468_v29 = vpop.eup %1235  ;;  %vm736_vm1 = vweird.f32 %v1462_v9  ;;  %v1212_v15 = vmul.f32 -1.442695, %v1476_v53  ;;  %v1504_v26 = vadd.f32 %v508_v2, %v485_v1  ;;  %1058 = vmatpush.msra.mxu2 %v936_v16  ;;  %v953_v57 = vld [vmem:[#allocation7 + $0x298] sm:$0xff] }
  0xdc   :  { %v1238_v34 = vpop.eup %1237  ;;  %1239 = vrcp.f32 %v1464_v21  ;;  %v746_v45 = vmul.f32 %v1468_v29, %v1458_v4  ;;  %vm1493_vm2 = vmor %vm735_vm0, %vm736_vm1  ;;  %vm751_vm5 = vweird.f32 %v1468_v29  ;;  %1104 = vmatpush.msrb.mxu0 %v873_v20  ;;  %1125 = vmatpush.msrb.mxu1 %v909_v28  ;;  %vm795_vm8 = vweird.f32 %v1464_v21 }
  0xdd   :  { %v732_v38 = vsub.f32 1.0, %v731_v23  ;;  %v1473_v46 = vadd.f32 1.0, %v1238_v34  ;;  %v972_v23 = vld [vmem:[#allocation7 + $0x330] sm:$0xff]  ;;  %1059 = vmatpush.msra.mxu2 %v934_v22  ;;  %vm1522_vm6 = vmor %vm750_vm3, %vm751_vm5  ;;  %v801_v5 = vand.u32 2147483648, %v1464_v21  ;;  %v971_v22 = vld [vmem:[#allocation7 + $0x328] sm:$0xff] }
  0xde   :  { %v747_v0 = vsub.f32 1.0, %v746_v45  ;;  %1079 = vmatpush.msra.mxu3 %v972_v23  ;;  %1105 = vmatpush.msrb.mxu0 %v871_v27  ;;  %v1213_v45 = vmul.f32 -1.442695, %v1504_v26 }
  0xdf   :  { %v733_v52 = vmul.f32 %v1462_v9, %v732_v38  ;;  %1241 = vrcp.f32 %v1473_v46  ;;  %v756_v38 = vand.u32 2147483648, %v1458_v4  ;;  %1136 = vmatpush.msrb.mxu2 %v965_v35  ;;  %1126 = vmatpush.msrb.mxu1 %v907_v39  ;;  %v961_v4 = vld [vmem:[#allocation7 + $0x2d8] sm:$0xff]  ;;  %vm810_vm12 = vweird.f32 %v1473_v46 }
  0xe0   :  { %v748_v55 = vmul.f32 %v1468_v29, %v747_v0  ;;  %1243 = vpow2.f32 %v1212_v15  ;;  %1080 = vmatpush.msra.mxu3 %v970_v36  ;;  %v814_v28 = vand.u32 2147483647, %v1473_v46  ;;  %v951_v36 = vld [vmem:[#allocation7 + $0x288] sm:$0xff] }
  0xe1   :  { %v734_v13 = vadd.f32 %v1462_v9, %v733_v52  ;;  %v757_v60 = vor.u32 1.1754944e-38, %v756_v38  ;;  %1127 = vmatpush.msrb.mxu1 %v905_v47  ;;  %1245 = vpow2.f32 %v1213_v45  ;;  %v949_v45 = vld [vmem:[#allocation7 + $0x278] sm:$0xff]  ;;  %v987_v47 = vld [vmem:[#allocation7 + $0x3a8] sm:$0xff] }
  0xe2   :  { %v1478_v59 = vpop.eup %1239  ;;  %v442_v8 = vpop.f32.mrf.mxu0  ;;  %v749_v40 = vadd.f32 %v1468_v29, %v748_v55  ;;  %1081 = vmatpush.msra.mxu3 %v968_v41  ;;  %vm815_vm15 = vcmp.eq.f32.partialorder %v814_v28, 8.507059e+37  ;;  %v939_v15 = vld [vmem:[#allocation7 + $0x228] sm:$0xff] }
  0xe3   :  { %v791_v14 = vmul.f32 %v1478_v59, %v1464_v21  ;;  %v465_v19 = vpop.f32.mrf.mxu1  ;;  %v738_v31 = vsel %vm1493_vm2, %v1462_v9, %v734_v13  ;;  %v963_v9 = vld [vmem:[#allocation7 + $0x2e8] sm:$0xff]  ;;  %v488_v51 = vpop.f32.mrf.mxu2  ;;  %vm796_vm9 = vweird.f32 %v1478_v59  ;;  %1128 = vmatpush.msrb.mxu1 %v903_v61 }
  0xe4   :  { %v1511_v34 = vadd.f32 %v465_v19, %v442_v8  ;;  %v743_v42 = vsel %vm1499_vm4, %v742_v24, %v738_v31  ;;  %v511_v52 = vpop.f32.mrf.mxu3  ;;  %1137 = vmatpush.msrb.mxu2 %v963_v9  ;;  %v753_v2 = vsel %vm1522_vm6, %v1468_v29, %v749_v40  ;;  %1082 = vmatpush.msra.mxu3 %v966_v56  ;;  %v799_v29 = vand.u32 2147483647, %v1464_v21  ;;  %vm1550_vm10 = vmor %vm795_vm8, %vm796_vm9  ;;  %v955_v21 = vld [vmem:[#allocation7 + $0x2a8] sm:$0xff]  ;;  %v985_v56 = vld [vmem:[#allocation7 + $0x398] sm:$0xff] }
  0xe5   :  { %v1506_v30 = vpop.eup %1241  ;;  %v792_v32 = vsub.f32 1.0, %v791_v14  ;;  %v850_v1 = vmul.f32 %v743_v42, %v1444_v25  ;;  %v1542_v7 = vadd.f32 %v511_v52, %v488_v51  ;;  %v995_v25 = vld [vmem:[#allocation7 + $0x3e8] sm:$0xff]  ;;  %v957_v14 = vld [vmem:[#allocation7 + $0x2b8] sm:$0xff]  ;;  %v758_v18 = vsel %vm1531_vm7, %v757_v60, %v753_v2 }
  0xe6   :  { %v806_v44 = vmul.f32 %v1506_v30, %v1473_v46  ;;  %v1216_v50 = vmul.f32 -1.442695, %v1511_v34  ;;  %v1244_v0 = vpop.eup %1243  ;;  %1138 = vmatpush.msrb.mxu2 %v961_v4  ;;  %1159 = vmatpush.msrb.mxu3 %v997_v62  ;;  %v802_v8 = vor.u32 1.1754944e-38, %v801_v5  ;;  %vm1565_vm11 = vcmp.eq.f32.partialorder %v799_v29, 8.507059e+37  ;;  %v991_v24 = vld [vmem:[#allocation7 + $0x3c8] sm:$0xff]  ;;  %v945_v60 = vld [vmem:[#allocation7 + $0x258] sm:$0xff] }
  0xe7   :  { %v793_v49 = vmul.f32 %v1478_v59, %v792_v32  ;;  %v1554_v16 = vadd.f32 1.0, %v1244_v0  ;;  %v1217_v20 = vmul.f32 -1.442695, %v1542_v7  ;;  %v1246_v23 = vpop.eup %1245  ;;  %vm811_vm13 = vweird.f32 %v1506_v30  ;;  %v947_v4 = vld [vmem:[#allocation7 + $0x268] sm:$0xff] }
  0xe8   :  { %v807_v6 = vsub.f32 1.0, %v806_v44  ;;  %1247 = vpow2.f32 %v1216_v50  ;;  %1139 = vmatpush.msrb.mxu2 %v959_v3  ;;  %1160 = vmatpush.msrb.mxu3 %v995_v25  ;;  %v816_v31 = vand.u32 2147483648, %v1473_v46  ;;  %vm1583_vm14 = vmor %vm810_vm12, %vm811_vm13  ;;  %v1587_v9 = vadd.f32 1.0, %v1246_v23  ;;  %v983_v61 = vld [vmem:[#allocation7 + $0x388] sm:$0xff] }
  0xe9   :  { %v794_v12 = vadd.f32 %v1478_v59, %v793_v49  ;;  %1249 = vrcp.f32 %v1554_v16  ;;  %v943_v0 = vld [vmem:[#allocation7 + $0x248] sm:$0xff]  ;;  %vm765_vm0 = vweird.f32 %v1554_v16  ;;  %v771_v23 = vand.u32 2147483648, %v1554_v16 }
  0xea   :  { %v808_v19 = vmul.f32 %v1506_v30, %v807_v6  ;;  %1140 = vmatpush.msrb.mxu2 %v957_v14  ;;  %1161 = vmatpush.msrb.mxu3 %v993_v54  ;;  %1251 = vpow2.f32 %v1217_v20  ;;  %v817_v50 = vor.u32 1.1754944e-38, %v816_v31  ;;  %v979_v25 = vld [vmem:[#allocation7 + $0x368] sm:$0xff]  ;;  %vm780_vm4 = vweird.f32 %v1587_v9 }
  0xeb   :  { %v798_v55 = vsel %vm1550_vm10, %v1478_v59, %v794_v12  ;;  %v851_v59 = vmul.f32 %v758_v18, %v1447_v33  ;;  %1253 = vrcp.f32 %v1587_v9  ;;  %v977_v18 = vld [vmem:[#allocation7 + $0x358] sm:$0xff]  ;;  %v935_v54 = vld [vmem:[#allocation7 + $0x208] sm:$0xff] }
  0xec   :  { %1141 = vmatpush.msrb.mxu2 %v955_v21  ;;  %1162 = vmatpush.msrb.mxu3 %v991_v24  ;;  %v803_v38 = vsel %vm1565_vm11, %v802_v8, %v798_v55  ;;  %v809_v39 = vadd.f32 %v1506_v30, %v808_v19  ;;  %v937_v8 = vld [vmem:[#allocation7 + $0x218] sm:$0xff] }
  0xed   :  { %v854_v49 = vmul.f32 %v803_v38, %v1450_v48  ;;  %v973_v55 = vld [vmem:[#allocation7 + $0x338] sm:$0xff] }
  0xee   :  { %v1248_v27 = vpop.eup %1247  ;;  %1142 = vmatpush.msrb.mxu2 %v953_v57  ;;  %1163 = vmatpush.msrb.mxu3 %v989_v37  ;;  %v813_v52 = vsel %vm1583_vm14, %v1506_v30, %v809_v39  ;;  %v969_v24 = vld [vmem:[#allocation7 + $0x318] sm:$0xff]  ;;  %v784_v39 = vand.u32 2147483647, %v1587_v9 }
  0xef   :  { %v1589_v41 = vadd.f32 1.0, %v1248_v27  ;;  %v1594_v51 = vpop.eup %1249  ;;  %v818_v62 = vsel %vm815_vm15, %v817_v50, %v813_v52 }
  0xf0   :  { %1143 = vmatpush.msrb.mxu2 %v951_v36  ;;  %1164 = vmatpush.msrb.mxu3 %v987_v47  ;;  %v1252_v48 = vpop.eup %1251  ;;  %v761_v30 = vmul.f32 %v1594_v51, %v1554_v16  ;;  %v855_v6 = vmul.f32 %v818_v62, %v1455_v63  ;;  %v975_v63 = vld [vmem:[#allocation7 + $0x348] sm:$0xff]  ;;  %vm766_vm1 = vweird.f32 %v1594_v51  ;;  %vm785_vm10 = vcmp.eq.f32.partialorder %v784_v39, 8.507059e+37 }
  0xf1   :  { %1255 = vrcp.f32 %v1589_v41  ;;  %v1607_v2 = vadd.f32 1.0, %v1252_v48  ;;  %v1610_v12 = vpop.eup %1253  ;;  %vm1631_vm2 = vmor %vm765_vm0, %vm766_vm1  ;;  %vm825_vm6 = vweird.f32 %v1589_v41 }
  0xf2   :  { %1144 = vmatpush.msrb.mxu2 %v949_v45  ;;  %1165 = vmatpush.msrb.mxu3 %v985_v56  ;;  %v762_v29 = vsub.f32 1.0, %v761_v30  ;;  %v776_v19 = vmul.f32 %v1610_v12, %v1587_v9  ;;  %vm781_vm5 = vweird.f32 %v1610_v12 }
  0xf3   :  { %1257 = vrcp.f32 %v1607_v2  ;;  %vm1652_vm8 = vmor %vm780_vm4, %vm781_vm5  ;;  %vm840_vm12 = vweird.f32 %v1607_v2 }
  0xf4   :  { %1145 = vmatpush.msrb.mxu2 %v947_v4  ;;  %1166 = vmatpush.msrb.mxu3 %v983_v61  ;;  %v763_v20 = vmul.f32 %v1594_v51, %v762_v29  ;;  %v777_v57 = vsub.f32 1.0, %v776_v19  ;;  %v846_v61 = vand.u32 2147483648, %v1607_v2 }
  0xf5   :  { %v531_v10 = vpop.f32.mrf.mxu0  ;;  %v554_v11 = vpop.f32.mrf.mxu1 }
  0xf6   :  { %v555_v13 = vadd.f32 %v554_v11, %v531_v10  ;;  %1146 = vmatpush.msrb.mxu2 %v945_v60  ;;  %v941_v11 = vld [vmem:[#allocation7 + $0x238] sm:$0xff]  ;;  %v778_v36 = vmul.f32 %v1610_v12, %v777_v57  ;;  %v847_v29 = vor.u32 1.1754944e-38, %v846_v61 }
  0xf8   :  { %v1556_v17 = vmul.f32 %v850_v1, %v555_v13  ;;  %v981_v1 = vld [vmem:[#allocation7 + $0x378] sm:$0xff]  ;;  %1147 = vmatpush.msrb.mxu2 %v943_v0  ;;  %v1612_v13 = vpop.eup %1255  ;;  %v844_v0 = vand.u32 2147483647, %v1607_v2 }
  0xf9   :  { %1167 = vmatpush.msrb.mxu3 %v981_v1  ;;  %v821_v21 = vmul.f32 %v1612_v13, %v1589_v41  ;;  %v1627_v27 = vpop.eup %1257  ;;  %vm826_vm7 = vweird.f32 %v1612_v13 }
  0xfa   :  { %1014 = vmatmul.f32.vlgmr.msra.gmra.mxu0 %v1556_v17  ;;  %1148 = vmatpush.msrb.mxu2 %v941_v11  ;;  %v836_v37 = vmul.f32 %v1627_v27, %v1607_v2  ;;  %vm1658_vm9 = vmor %vm825_vm6, %vm826_vm7  ;;  %vm841_vm13 = vweird.f32 %v1627_v27  ;;  %vm845_vm15 = vcmp.eq.f32.partialorder %v844_v0, 8.507059e+37 }
  0xfb   :  { %1168 = vmatpush.msrb.mxu3 %v979_v25  ;;  %v822_v28 = vsub.f32 1.0, %v821_v21  ;;  %vm1676_vm14 = vmor %vm840_vm12, %vm841_vm13 }
  0xfc   :  { %v577_v32 = vpop.f32.mrf.mxu2  ;;  %v600_v35 = vpop.f32.mrf.mxu3  ;;  %1149 = vmatpush.msrb.mxu2 %v939_v15 }
  0xfd   :  { %v601_v40 = vadd.f32 %v600_v35, %v577_v32  ;;  %1169 = vmatpush.msrb.mxu3 %v977_v18  ;;  %v967_v32 = vld [vmem:[#allocation7 + $0x308] sm:$0xff]  ;;  %v772_v35 = vor.u32 1.1754944e-38, %v771_v23  ;;  %v823_v38 = vmul.f32 %v1612_v13, %v822_v28 }
  0xfe   :  { %1150 = vmatpush.msrb.mxu2 %v937_v8 }
  0xff   :  { %v1591_v42 = vmul.f32 %v851_v59, %v601_v40  ;;  %v534_v43 = vpop.f32.mrf.mxu0  ;;  %v557_v44 = vpop.f32.mrf.mxu1  ;;  %1170 = vmatpush.msrb.mxu3 %v975_v63  ;;  %v764_v59 = vadd.f32 %v1594_v51, %v763_v20  ;;  %v786_v40 = vand.u32 2147483648, %v1587_v9  ;;  %v824_v47 = vadd.f32 %v1612_v13, %v823_v38 }
 0x100   :  { %v558_v46 = vadd.f32 %v557_v44, %v534_v43  ;;  %1151 = vmatpush.msrb.mxu2 %v935_v54  ;;  %v831_v43 = vand.u32 2147483648, %v1589_v41  ;;  %v837_v44 = vsub.f32 1.0, %v836_v37 }
 0x101   :  { %1037 = vmatmul.f32.vlgmr.msra.gmra.mxu1 %v1591_v42  ;;  %1171 = vmatpush.msrb.mxu3 %v973_v55  ;;  %v787_v52 = vor.u32 1.1754944e-38, %v786_v40 }
 0x102   :  { %v1601_v58 = vmul.f32 %v854_v49, %v558_v46  ;;  %v829_v49 = vand.u32 2147483647, %v1589_v41  ;;  %v838_v48 = vmul.f32 %v1627_v27, %v837_v44  ;;  %v828_v41 = vsel %vm1658_vm9, %v1612_v13, %v824_v47 }
 0x103   :  { %1172 = vmatpush.msrb.mxu3 %v971_v22 }
 0x104   :  { %1017 = vmatmul.f32.gmra.mxu0 %v1601_v58  ;;  %vm830_vm11 = vcmp.eq.f32.partialorder %v829_v49, 8.507059e+37  ;;  %v839_v30 = vadd.f32 %v1627_v27, %v838_v48 }
 0x105   :  { %1173 = vmatpush.msrb.mxu3 %v969_v24 }
 0x106   :  { %v580_v3 = vpop.f32.mrf.mxu2  ;;  %v603_v5 = vpop.f32.mrf.mxu3 }
 0x107   :  { %v604_v10 = vadd.f32 %v603_v5, %v580_v3  ;;  %1174 = vmatpush.msrb.mxu3 %v967_v32 }
 0x109   :  { %v1614_v14 = vmul.f32 %v855_v6, %v604_v10 }
 0x10b   :  { %1040 = vmatmul.f32.gmra.mxu1 %v1614_v14 }
 0x10c   :  { %1106 = vmatmul.f32.vlgmr.msrb.gmra.mxu0 %v1556_v17  ;;  %v769_v17 = vand.u32 2147483647, %v1554_v16  ;;  %v768_v16 = vsel %vm1631_vm2, %v1594_v51, %v764_v59 }
 0x10e   :  { %vm770_vm3 = vcmp.eq.f32.partialorder %v769_v17, 8.507059e+37 }
 0x10f   :  { %v773_v33 = vsel %vm770_vm3, %v772_v35, %v768_v16 }
 0x110   :  { %v852_v51 = vmul.f32 %v773_v33, %v1476_v53 }
 0x113   :  { %1129 = vmatmul.f32.vlgmr.msrb.gmra.mxu1 %v1591_v42  ;;  %v779_v42 = vadd.f32 %v1610_v12, %v778_v36 }
 0x114   :  { %1109 = vmatmul.f32.gmra.mxu0 %v1601_v58  ;;  %v832_v58 = vor.u32 1.1754944e-38, %v831_v43 }
 0x115   :  { %v783_v56 = vsel %vm1652_vm8, %v1610_v12, %v779_v42 }
 0x116   :  { %v788_v53 = vsel %vm785_vm10, %v787_v52, %v783_v56  ;;  %v833_v62 = vsel %vm830_vm11, %v832_v58, %v828_v41 }
 0x117   :  { %v853_v6 = vmul.f32 %v788_v53, %v1504_v26  ;;  %v856_v12 = vmul.f32 %v833_v62, %v1511_v34 }
 0x119   :  { %v623_v50 = vpop.f32.mrf.mxu0  ;;  %v646_v46 = vpop.f32.mrf.mxu1 }
 0x11a   :  { %v647_v4 = vadd.f32 %v646_v46, %v623_v50 }
 0x11b   :  { %1132 = vmatmul.f32.gmra.mxu1 %v1614_v14  ;;  %v843_v14 = vsel %vm1676_vm14, %v1627_v27, %v839_v30 }
 0x11c   :  { %v860_v60 = vmul.f32 %v852_v51, %v647_v4  ;;  %v848_v18 = vsel %vm845_vm15, %v847_v29, %v843_v14 }
 0x11d   :  { %v857_v26 = vmul.f32 %v848_v18, %v1542_v7 }
 0x11e   :  { %1060 = vmatmul.f32.vlgmr.msra.gmra.mxu2 %v860_v60 }
 0x120   :  { %v669_v3 = vpop.f32.mrf.mxu2  ;;  %v692_v5 = vpop.f32.mrf.mxu3 }
 0x121   :  { %v693_v10 = vadd.f32 %v692_v5, %v669_v3  ;;  %v626_v11 = vpop.f32.mrf.mxu0  ;;  %v649_v25 = vpop.f32.mrf.mxu1 }
 0x122   :  { %v650_v13 = vadd.f32 %v649_v25, %v626_v11 }
 0x123   :  { %v861_v2 = vmul.f32 %v853_v6, %v693_v10 }
 0x124   :  { %v864_v15 = vmul.f32 %v856_v12, %v650_v13 }
 0x125   :  { %1083 = vmatmul.f32.vlgmr.msra.gmra.mxu3 %v861_v2 }
 0x126   :  { %1063 = vmatmul.f32.gmra.mxu2 %v864_v15 }
 0x128   :  { %v672_v8 = vpop.f32.mrf.mxu2  ;;  %v695_v63 = vpop.f32.mrf.mxu3 }
 0x129   :  { %v696_v19 = vadd.f32 %v695_v63, %v672_v8 }
 0x12b   :  { %v865_v20 = vmul.f32 %v857_v26, %v696_v19 }
 0x12d   :  { %1086 = vmatmul.f32.gmra.mxu3 %v865_v20 }
 0x12e   :  { %1152 = vmatmul.f32.vlgmr.msrb.gmra.mxu2 %v860_v60 }
 0x135   :  { %1175 = vmatmul.f32.vlgmr.msrb.gmra.mxu3 %v861_v2 }
 0x136   :  { %1155 = vmatmul.f32.gmra.mxu2 %v864_v15 }
 0x13d   :  { %1178 = vmatmul.f32.gmra.mxu3 %v865_v20 }
 0x177   :  { %v1015_v21 = vpop.f32.mrf.mxu0 }
 0x17e   :  { %v1038_v34 = vpop.f32.mrf.mxu1 }
 0x17f   :  { %v1039_v55 = vadd.f32 %v1038_v34, %v1015_v21 }
 0x181   :  { %v1018_v57 = vpop.f32.mrf.mxu0 }
 0x188   :  { %v1041_v22 = vpop.f32.mrf.mxu1 }
 0x189   :  { %v1042_v17 = vadd.f32 %v1041_v22, %v1018_v57  ;;  %v1107_v35 = vpop.f32.mrf.mxu0 }
 0x190   :  { %v1130_v28 = vpop.f32.mrf.mxu1 }
 0x191   :  { %v1131_v37 = vadd.f32 %v1130_v28, %v1107_v35  ;;  %v1110_v33 = vpop.f32.mrf.mxu0 }
 0x198   :  { %v1133_v40 = vpop.f32.mrf.mxu1 }
 0x199   :  { %v1134_v43 = vadd.f32 %v1133_v40, %v1110_v33 }
 0x1a1   :  { %v1061_v54 = vpop.f32.mrf.mxu2 }
 0x1a2   :  { %v1062_v23 = vadd.f32 %v1061_v54, %v1039_v55 }
 0x1a8   :  { %v1084_v24 = vpop.f32.mrf.mxu3 }
 0x1a9   :  { %v1085_v27 = vadd.f32 %v1084_v24, %v1062_v23  ;;  %v1064_v59 = vpop.f32.mrf.mxu2 }
 0x1aa   :  { %v1065_v7 = vadd.f32 %v1064_v59, %v1042_v17 }
 0x1ab   :  { %1186 = vst [vmem:[#allocation8] sm:$0xff] %v1085_v27 }
 0x1b0   :  { %v1087_v31 = vpop.f32.mrf.mxu3 }
 0x1b1   :  { %v1088_v32 = vadd.f32 %v1087_v31, %v1065_v7  ;;  %v1153_v36 = vpop.f32.mrf.mxu2 }
 0x1b2   :  { %v1154_v16 = vadd.f32 %v1153_v36, %v1131_v37 }
 0x1b3   :  { %1188 = vst [vmem:[#allocation8 + $0x10] sm:$0xff] %v1088_v32 }
 0x1b8   :  { %v1176_v38 = vpop.f32.mrf.mxu3 }
 0x1b9   :  { %v1177_v39 = vadd.f32 %v1176_v38, %v1154_v16  ;;  %v1156_v42 = vpop.f32.mrf.mxu2 }
 0x1ba   :  { %v1157_v44 = vadd.f32 %v1156_v42, %v1134_v43 }
 0x1bb   :  { %1187 = vst [vmem:[#allocation8 + $0x8] sm:$0xff] %v1177_v39 }
 0x1c0   :  { %v1179_v45 = vpop.f32.mrf.mxu3 }
 0x1c1   :  { %v1180_v47 = vadd.f32 %v1179_v45, %v1157_v44 }
 0x1c3   :  { %1189 = vst [vmem:[#allocation8 + $0x18] sm:$0xff] %v1180_v47 }
 0x1c4   :  { %1202 = dma.vmem_to_hbm [thread:$0]  %s1195_s29, 512, %s1197_s5, [#allocation4], %s1365_s24, %s1365_s24, %s1366_s25  }
 0x1c5   :  { %1359 = dma.done.wait [#allocation4], 512  }
 0x1c6   :  { %1360 = vsyncadd [#allocation4], 4294966784 }
 0x1c7   :  { %1207 = vsyncpa [#allocation3], 1 }
 0x1c8   :  { %1208 = vsyncpa [#allocation6], 1 }
 0x1c9   :  { %1209 = vsyncpa [#allocation4], 1 }

</bundles_post_ra>
